<compile_context>
chip_gen: v7x
topology: tpu7x:2x2x1
jax: 0.10.0
libtpu: 0.0.40
codegen_flags: <defaults>
</compile_context>

<pallas_src>
import functools

import jax
import jax.numpy as jnp
from jax.experimental import pallas as pl
from jax.experimental.pallas import tpu as pltpu

LN_EPS = 1e-5   # torch.nn.LayerNorm default


def _round_up(n, m):
    return ((n + m - 1) // m) * m


def _cdiv(a, b):
    return (a + b - 1) // b


def _layer_norm(v, g, b):
    """Two-pass LayerNorm over the (true-width) last axis."""
    mu = jnp.mean(v, axis=-1, keepdims=True)
    d = v - mu
    var = jnp.mean(d * d, axis=-1, keepdims=True)
    return d * jax.lax.rsqrt(var + LN_EPS) * g + b      # rsqrt -> EUP


def dqn_forward_kernel(
    x_ref,      # (TB, W)      observations tile (int -> cast to f32 in-kernel)
    pv_ref,     # (8, PMAX)    packed param rows: g0,b0,bi1,g1,b1,bi2 (zero tail)
    w1_ref,     # (W, H)       hidden LayDense weight
    w2_ref,     # (H, A)       logits LayDense weight
    out_ref,    # (TB, A)      logits, f32
    *, obs_w, hid_w, act_w,
):
    x = x_ref[...].astype(jnp.float32)                  # observations.to(float32)

    pv = pv_ref[...]
    g0, b0 = pv[0:1, :obs_w], pv[1:2, :obs_w]
    bi1, g1, b1 = pv[2:3, :hid_w], pv[3:4, :hid_w], pv[4:5, :hid_w]
    bi2 = pv[5:6, :act_w]

    # self.ln(observations)
    h = _layer_norm(x, g0, b0)

    # hidden LayDense (ReLU, LayDense default) + LayerNorm
    h = jnp.dot(h, w1_ref[...], preferred_element_type=jnp.float32) + bi1
    h = jnp.maximum(h, 0.0)
    h = _layer_norm(h, g1, b1)

    # self.logits (LayDense, activation=None)
    out_ref[...] = jnp.dot(h, w2_ref[...], preferred_element_type=jnp.float32) + bi2


def pack_params(params):
    """One-time param prep (call once, NOT per forward).

    Packs the six (1,*) rows into a single (8, max(W,H,A)) array (zero tail)
    and passes the weight matrices through unpadded.
    """
    W = params["w1"].shape[0]
    H = params["w1"].shape[1]
    A = params["w2"].shape[1]
    pmax = max(W, H, A)
    rows = [params["g0"], params["b0"], params["bi1"],
            params["g1"], params["b1"], params["bi2"]]
    pv = jnp.zeros((8, pmax), jnp.float32)               # 8 rows: sublane aligned
    for r, row in enumerate(rows):
        pv = pv.at[r, : row.shape[1]].set(row[0].astype(jnp.float32))
    return {"pv": pv, "w1": params["w1"].astype(jnp.float32),
            "w2": params["w2"].astype(jnp.float32)}


def dqn_forward(observations, packed, *, single_step_max=1024, tb=512):
    """Forward pass. `packed` comes from pack_params() (hoisted out of hot path)."""
    B, W = observations.shape
    H = packed["w1"].shape[1]
    A = packed["w2"].shape[1]
    pmax = packed["pv"].shape[1]

    # --- batch tiling -------------------------------------------------------
    if B <= single_step_max:
        # Single grid step, block == full array: no batch padding, no slice.
        TB, Bp = B, B
        x = observations
    else:
        TB = _round_up(min(tb, B), 8)          # multiple of 8 sublanes
        n = _cdiv(B, TB)
        if n % 2:                              # even grid: balance v7x's 2 TCs
            n += 1
        Bp = n * TB
        x = jnp.pad(observations, ((0, Bp - B), (0, 0)))
    grid = (Bp // TB,)

    kernel = functools.partial(dqn_forward_kernel, obs_w=W, hid_w=H, act_w=A)

    const = lambda i: (0, 0)                   # params resident across grid steps
    itemsize = observations.dtype.itemsize
    cost = pl.CostEstimate(
        flops=2 * B * (W * H + H * A) + 12 * B * (W + H),   # matmuls + LN/ReLU
        transcendentals=2 * B,                               # two rsqrt per row
        bytes_accessed=B * W * itemsize + 4 * (8 * pmax + W * H + H * A + B * A),
    )

    logits = pl.pallas_call(
        kernel,
        out_shape=jax.ShapeDtypeStruct((Bp, A), jnp.float32),
        grid=grid,
        in_specs=[
            pl.BlockSpec((TB, W), lambda i: (i, 0)),     # observations tile
            pl.BlockSpec((8, pmax), const),              # packed param rows
            pl.BlockSpec((W, H), const),                 # w1
            pl.BlockSpec((H, A), const),                 # w2
        ],
        out_specs=pl.BlockSpec((TB, A), lambda i: (i, 0)),
        compiler_params=pltpu.CompilerParams(
            dimension_semantics=("parallel",),           # shard batch over TCs
        ),
        cost_estimate=cost,
    )(x, packed["pv"], packed["w1"], packed["w2"])

    if Bp != B:
        logits = logits[:B]
    return {"logits": logits}


def init_params(key, observation_width=4, hidden=12, num_actions=4):
    """Deterministic synthetic init matching DQNModel(__init__) shapes."""
    k1, k2, k3, k4 = jax.random.split(key, 4)
    W, H, A = observation_width, hidden, num_actions
    return {
        "g0": jnp.ones((1, W), jnp.float32),
        "b0": jnp.zeros((1, W), jnp.float32),
        "w1": jax.random.normal(k1, (W, H), jnp.float32) * 0.5,
        "bi1": jax.random.normal(k2, (1, H), jnp.float32) * 0.1,
        "g1": jnp.ones((1, H), jnp.float32),
        "b1": jnp.zeros((1, H), jnp.float32),
        "w2": jax.random.normal(k3, (H, A), jnp.float32) * 0.5,
        "bi2": jax.random.normal(k4, (1, A), jnp.float32) * 0.1,
    }


def _reference_forward(observations, p):
    """Pure-JAX reference matching the PyTorch module."""
    def ln(v, g, b):
        mu = jnp.mean(v, axis=-1, keepdims=True)
        var = jnp.mean((v - mu) ** 2, axis=-1, keepdims=True)
        return (v - mu) / jnp.sqrt(var + LN_EPS) * g + b

    x = observations.astype(jnp.float32)
    h = ln(x, p["g0"], p["b0"])
    h = jnp.maximum(h @ p["w1"] + p["bi1"], 0.0)
    h = ln(h, p["g1"], p["b1"])
    return h @ p["w2"] + p["bi2"]


if __name__ == "__main__":
    key = jax.random.PRNGKey(0)
    k_obs, k_obs2, k_par = jax.random.split(key, 3)

    W, H, A = 4, 12, 4                 # DQNModel defaults
    params = init_params(k_par, observation_width=W, hidden=H, num_actions=A)
    packed = pack_params(params)       # hoisted one-time param prep

    # Small-batch path: single grid step, full-array block, no padding.
    B1 = 300
    obs1 = jax.random.randint(k_obs, (B1, W), minval=0, maxval=5, dtype=jnp.int32)
    out1 = dqn_forward(obs1, packed)
    logits1 = jax.block_until_ready(out1["logits"])
    ref1 = _reference_forward(obs1, params)
    assert logits1.shape == (B1, A)
    assert jnp.allclose(logits1, ref1, atol=1e-4, rtol=1e-4), "mismatch (small batch)"

    # Large-batch path: gridded batch axis (TB=512, even grid length for v7x).
    B2 = 2000
    obs2 = jax.random.randint(k_obs2, (B2, W), minval=0, maxval=5, dtype=jnp.int32)
    out2 = dqn_forward(obs2, packed)
    logits2 = jax.block_until_ready(out2["logits"])
    ref2 = _reference_forward(obs2, params)
    assert logits2.shape == (B2, A)
    assert jnp.allclose(logits2, ref2, atol=1e-4, rtol=1e-4), "mismatch (large batch)"

    # TODO(synk): loss() (MSE/Huber + mask + mean) is training-only glue, not
    # part of the forward hot path; left to plain XLA.
    print("KERNEL_OK")
</pallas_src>

<mosaic_0001>
module attributes {stable_mosaic.version = 11 : i64} {
  func.func @dqn_forward_kernel(%arg0: i32, %arg1: memref<300x4xi32, #tpu.memory_space<vmem>>, %arg2: memref<8x12xf32, #tpu.memory_space<vmem>>, %arg3: memref<4x12xf32, #tpu.memory_space<vmem>>, %arg4: memref<12x4xf32, #tpu.memory_space<vmem>>, %arg5: memref<300x4xf32, #tpu.memory_space<vmem>>) attributes {dimension_semantics = [#tpu.dimension_semantics<parallel>], iteration_bounds = array<i64: 1>, scalar_prefetch = 0 : i64, scratch_operands = 0 : i64, tpu.core_type = #tpu.core_type<tc>, window_params = [{transform_indices = @transform_0, window_bounds = array<i64: 300, 4>}, {pipeline_mode = #tpu.pipeline_mode<synchronous>, transform_indices = @transform_1, window_bounds = array<i64: 8, 12>}, {pipeline_mode = #tpu.pipeline_mode<synchronous>, transform_indices = @transform_2, window_bounds = array<i64: 4, 12>}, {pipeline_mode = #tpu.pipeline_mode<synchronous>, transform_indices = @transform_3, window_bounds = array<i64: 12, 4>}, {transform_indices = @transform_4, window_bounds = array<i64: 300, 4>}]} {
    %c0 = arith.constant 0 : index
    %c0_0 = arith.constant 0 : index
    %0 = vector.load %arg1[%c0, %c0_0] : memref<300x4xi32, #tpu.memory_space<vmem>>, vector<300x4xi32>
    %1 = arith.sitofp %0 : vector<300x4xi32> to vector<300x4xf32>
    %c0_1 = arith.constant 0 : index
    %c0_2 = arith.constant 0 : index
    %2 = vector.load %arg2[%c0_1, %c0_2] : memref<8x12xf32, #tpu.memory_space<vmem>>, vector<8x12xf32>
    %3 = vector.extract_strided_slice %2 {offsets = [0, 0], sizes = [1, 4], strides = [1, 1]} : vector<8x12xf32> to vector<1x4xf32>
    %4 = vector.extract_strided_slice %2 {offsets = [1, 0], sizes = [1, 4], strides = [1, 1]} : vector<8x12xf32> to vector<1x4xf32>
    %5 = vector.extract_strided_slice %2 {offsets = [2, 0], sizes = [1, 12], strides = [1, 1]} : vector<8x12xf32> to vector<1x12xf32>
    %6 = vector.extract_strided_slice %2 {offsets = [3, 0], sizes = [1, 12], strides = [1, 1]} : vector<8x12xf32> to vector<1x12xf32>
    %7 = vector.extract_strided_slice %2 {offsets = [4, 0], sizes = [1, 12], strides = [1, 1]} : vector<8x12xf32> to vector<1x12xf32>
    %8 = vector.extract_strided_slice %2 {offsets = [5, 0], sizes = [1, 4], strides = [1, 1]} : vector<8x12xf32> to vector<1x4xf32>
    %cst = arith.constant dense<0.000000e+00> : vector<300xf32>
    %9 = vector.multi_reduction <add>, %1, %cst [1] : vector<300x4xf32> to vector<300xf32>
    %10 = vector.shape_cast %9 : vector<300xf32> to vector<300x1xf32>
    %cst_3 = arith.constant 4.000000e+00 : f32
    %11 = vector.broadcast %cst_3 : f32 to vector<300x1xf32>
    %12 = arith.divf %10, %11 : vector<300x1xf32>
    %13 = vector.broadcast %12 : vector<300x1xf32> to vector<300x4xf32>
    %14 = arith.subf %1, %13 : vector<300x4xf32>
    %15 = arith.mulf %14, %14 : vector<300x4xf32>
    %cst_4 = arith.constant dense<0.000000e+00> : vector<300xf32>
    %16 = vector.multi_reduction <add>, %15, %cst_4 [1] : vector<300x4xf32> to vector<300xf32>
    %17 = vector.shape_cast %16 : vector<300xf32> to vector<300x1xf32>
    %cst_5 = arith.constant 4.000000e+00 : f32
    %18 = vector.broadcast %cst_5 : f32 to vector<300x1xf32>
    %19 = arith.divf %17, %18 : vector<300x1xf32>
    %cst_6 = arith.constant 9.99999974E-6 : f32
    %20 = vector.broadcast %cst_6 : f32 to vector<300x1xf32>
    %21 = arith.addf %19, %20 : vector<300x1xf32>
    %22 = math.rsqrt %21 : vector<300x1xf32>
    %23 = vector.broadcast %22 : vector<300x1xf32> to vector<300x4xf32>
    %24 = arith.mulf %14, %23 : vector<300x4xf32>
    %25 = vector.broadcast %3 : vector<1x4xf32> to vector<300x4xf32>
    %26 = arith.mulf %24, %25 : vector<300x4xf32>
    %27 = vector.broadcast %4 : vector<1x4xf32> to vector<300x4xf32>
    %28 = arith.addf %26, %27 : vector<300x4xf32>
    %c0_7 = arith.constant 0 : index
    %c0_8 = arith.constant 0 : index
    %29 = vector.load %arg3[%c0_7, %c0_8] : memref<4x12xf32, #tpu.memory_space<vmem>>, vector<4x12xf32>
    %cst_9 = arith.constant dense<0.000000e+00> : vector<300x12xf32>
    %30 = tpu.matmul %28, %29, %cst_9 {dimension_numbers = #tpu.dot_dimension_numbers<[1], [0], [0], [1], [0, 0, 1, 1], [], []>} : vector<300x4xf32>, vector<4x12xf32>, vector<300x12xf32> -> vector<300x12xf32>
    %31 = vector.broadcast %5 : vector<1x12xf32> to vector<300x12xf32>
    %32 = arith.addf %30, %31 : vector<300x12xf32>
    %cst_10 = arith.constant 0.000000e+00 : f32
    %33 = vector.broadcast %cst_10 : f32 to vector<300x12xf32>
    %34 = arith.maximumf %32, %33 : vector<300x12xf32>
    %cst_11 = arith.constant dense<0.000000e+00> : vector<300xf32>
    %35 = vector.multi_reduction <add>, %34, %cst_11 [1] : vector<300x12xf32> to vector<300xf32>
    %36 = vector.shape_cast %35 : vector<300xf32> to vector<300x1xf32>
    %cst_12 = arith.constant 1.200000e+01 : f32
    %37 = vector.broadcast %cst_12 : f32 to vector<300x1xf32>
    %38 = arith.divf %36, %37 : vector<300x1xf32>
    %39 = vector.broadcast %38 : vector<300x1xf32> to vector<300x12xf32>
    %40 = arith.subf %34, %39 : vector<300x12xf32>
    %41 = arith.mulf %40, %40 : vector<300x12xf32>
    %cst_13 = arith.constant dense<0.000000e+00> : vector<300xf32>
    %42 = vector.multi_reduction <add>, %41, %cst_13 [1] : vector<300x12xf32> to vector<300xf32>
    %43 = vector.shape_cast %42 : vector<300xf32> to vector<300x1xf32>
    %cst_14 = arith.constant 1.200000e+01 : f32
    %44 = vector.broadcast %cst_14 : f32 to vector<300x1xf32>
    %45 = arith.divf %43, %44 : vector<300x1xf32>
    %cst_15 = arith.constant 9.99999974E-6 : f32
    %46 = vector.broadcast %cst_15 : f32 to vector<300x1xf32>
    %47 = arith.addf %45, %46 : vector<300x1xf32>
    %48 = math.rsqrt %47 : vector<300x1xf32>
    %49 = vector.broadcast %48 : vector<300x1xf32> to vector<300x12xf32>
    %50 = arith.mulf %40, %49 : vector<300x12xf32>
    %51 = vector.broadcast %6 : vector<1x12xf32> to vector<300x12xf32>
    %52 = arith.mulf %50, %51 : vector<300x12xf32>
    %53 = vector.broadcast %7 : vector<1x12xf32> to vector<300x12xf32>
    %54 = arith.addf %52, %53 : vector<300x12xf32>
    %c0_16 = arith.constant 0 : index
    %c0_17 = arith.constant 0 : index
    %55 = vector.load %arg4[%c0_16, %c0_17] : memref<12x4xf32, #tpu.memory_space<vmem>>, vector<12x4xf32>
    %cst_18 = arith.constant dense<0.000000e+00> : vector<300x4xf32>
    %56 = tpu.matmul %54, %55, %cst_18 {dimension_numbers = #tpu.dot_dimension_numbers<[1], [0], [0], [1], [0, 0, 1, 1], [], []>} : vector<300x12xf32>, vector<12x4xf32>, vector<300x4xf32> -> vector<300x4xf32>
    %57 = vector.broadcast %8 : vector<1x4xf32> to vector<300x4xf32>
    %58 = arith.addf %56, %57 : vector<300x4xf32>
    %c0_19 = arith.constant 0 : index
    %c0_20 = arith.constant 0 : index
    %59 = vector.load %arg5[%c0_19, %c0_20] : memref<300x4xf32, #tpu.memory_space<vmem>>, vector<300x4xf32>
    tpu.vector_store %arg5[%c0_19, %c0_20], %58 {strides = array<i32>} : memref<300x4xf32, #tpu.memory_space<vmem>>, vector<300x4xf32>,
    return
  }
  func.func @transform_0(%arg0: i32) -> (i32, i32) {
    %c0_i32 = arith.constant 0 : i32
    %c0_i32_0 = arith.constant 0 : i32
    return %arg0, %c0_i32 : i32, i32
  }
  func.func @transform_1(%arg0: i32) -> (i32, i32) {
    %c0_i32 = arith.constant 0 : i32
    %c0_i32_0 = arith.constant 0 : i32
    %c0_i32_1 = arith.constant 0 : i32
    return %c0_i32, %c0_i32_0 : i32, i32
  }
  func.func @transform_2(%arg0: i32) -> (i32, i32) {
    %c0_i32 = arith.constant 0 : i32
    %c0_i32_0 = arith.constant 0 : i32
    %c0_i32_1 = arith.constant 0 : i32
    return %c0_i32, %c0_i32_0 : i32, i32
  }
  func.func @transform_3(%arg0: i32) -> (i32, i32) {
    %c0_i32 = arith.constant 0 : i32
    %c0_i32_0 = arith.constant 0 : i32
    %c0_i32_1 = arith.constant 0 : i32
    return %c0_i32, %c0_i32_0 : i32, i32
  }
  func.func @transform_4(%arg0: i32) -> (i32, i32) {
    %c0_i32 = arith.constant 0 : i32
    %c0_i32_0 = arith.constant 0 : i32
    return %arg0, %c0_i32 : i32, i32
  }
}

</mosaic_0001>

<bundles_post_ra>
// kernel: tpu_custom_call.1
= control target key start
LH: loop header
LB: loop body
LE: loop exit
PB: predicated region body
PF: predicated region fallthrough
CT: control target
= control target key end

     0   :  { %vm94_vm0 = vcmask 31744   ;;  %vm206_vm1 = vcmask 27648   ;;  %vm794_vm2 = vcmask 1043456   ;;  %vm1091_vm3 = vcmask 97280   ;;  %s4237_s0 = inlined_call_operand.vmem [shape: s32[300,4], index: 0, kind: input, shape index: {}]   ;;  %s4238_s2 = inlined_call_operand.vmem [shape: f32[4,12], index: 2, kind: input, shape index: {}]   ;;  %s4239_s1 = inlined_call_operand.vmem [shape: f32[8,12], index: 1, kind: input, shape index: {}]   ;;  %s4240_s3 = inlined_call_operand.vmem [shape: f32[12,4], index: 3, kind: input, shape index: {}]   ;;  %s4241_s4 = inlined_call_operand.vmem [shape: f32[300,4], index: 4, kind: output, shape index: {}]  }
   0x1   :  { %v2558_v0 = vld [vmem:[%s4237_s0] sm:$0xff]  ;;  %v2563_v1 = vld [vmem:[%s4237_s0 + $0x10] sm:$0xff]  ;;  %v2568_v2 = vld [vmem:[%s4237_s0 + $0x8] sm:$0xff]  ;;  %vm1203_vm4 = vcmask 93184   ;;  %vm2529_vm5 = vmmov 1  }
   0x2   :  { %v55_v3 = vcvt.s32.f32 %v2558_v0  ;;  %v57_v4 = vcvt.s32.f32 %v2563_v1  ;;  %v56_v5 = vcvt.s32.f32 %v2568_v2  ;;  %v2576_v6 = vld [vmem:[%s4237_s0 + $0x18] sm:$0xff]  ;;  %v2582_v8 = vld [vmem:[%s4237_s0 + $0x20] sm:$0xff]  ;;  %v2587_v9 = vld [vmem:[%s4237_s0 + $0x28] sm:$0xff] }
   0x3   :  { %v58_v7 = vcvt.s32.f32 %v2576_v6  ;;  %v59_v14 = vcvt.s32.f32 %v2582_v8  ;;  %v60_v15 = vcvt.s32.f32 %v2587_v9  ;;  %v2606_v16 = vld [vmem:[%s4237_s0 + $0x30] sm:$0xff]  ;;  %v2611_v17 = vld [vmem:[%s4237_s0 + $0x38] sm:$0xff]  ;;  %v2624_v22 = vld [vmem:[%s4237_s0 + $0x40] sm:$0xff] }
   0x4   :  { %v95_v10 = vsel %vm94_vm0, %v55_v3, 0.0  ;;  %v101_v11 = vsel %vm94_vm0, %v57_v4, 0.0  ;;  %v98_v12 = vsel %vm94_vm0, %v56_v5, 0.0  ;;  %v61_v20 = vcvt.s32.f32 %v2606_v16  ;;  %v2629_v23 = vld [vmem:[%s4237_s0 + $0x48] sm:$0xff]  ;;  %v2642_v28 = vld [vmem:[%s4237_s0 + $0x50] sm:$0xff]  ;;  %v2647_v29 = vld [vmem:[%s4237_s0 + $0x58] sm:$0xff] }
   0x5   :  { %96 = vadd.xlane.f32.xlu0 %v95_v10  ;;  %102 = vadd.xlane.f32.xlu1 %v101_v11  ;;  %v104_v13 = vsel %vm94_vm0, %v58_v7, 0.0  ;;  %v107_v18 = vsel %vm94_vm0, %v59_v14, 0.0  ;;  %v110_v19 = vsel %vm94_vm0, %v60_v15, 0.0  ;;  %v62_v21 = vcvt.s32.f32 %v2611_v17  ;;  %v2660_v34 = vld [vmem:[%s4237_s0 + $0x60] sm:$0xff]  ;;  %v2665_v35 = vld [vmem:[%s4237_s0 + $0x68] sm:$0xff]  ;;  %v2678_v40 = vld [vmem:[%s4237_s0 + $0x70] sm:$0xff] }
   0x6   :  { %v113_v24 = vsel %vm94_vm0, %v61_v20, 0.0  ;;  %v63_v26 = vcvt.s32.f32 %v2624_v22  ;;  %v64_v27 = vcvt.s32.f32 %v2629_v23  ;;  %v65_v32 = vcvt.s32.f32 %v2642_v28  ;;  %v2683_v41 = vld [vmem:[%s4237_s0 + $0x78] sm:$0xff]  ;;  %v2696_v46 = vld [vmem:[%s4237_s0 + $0x80] sm:$0xff]  ;;  %v2701_v47 = vld [vmem:[%s4237_s0 + $0x88] sm:$0xff] }
   0x7   :  { %v116_v25 = vsel %vm94_vm0, %v62_v21, 0.0  ;;  %v66_v33 = vcvt.s32.f32 %v2647_v29  ;;  %v67_v38 = vcvt.s32.f32 %v2660_v34  ;;  %v4265_v39 = vcvt.s32.f32 %v2665_v35  ;;  %v2714_v52 = vld [vmem:[%s4237_s0 + $0x90] sm:$0xff]  ;;  %v2719_v53 = vld [vmem:[%s4237_s0 + $0x98] sm:$0xff]  ;;  %v2732_v58 = vld [vmem:[%s4237_s0 + $0xa0] sm:$0xff] }
   0x8   :  { %v119_v30 = vsel %vm94_vm0, %v63_v26, 0.0  ;;  %v122_v31 = vsel %vm94_vm0, %v64_v27, 0.0  ;;  %v125_v36 = vsel %vm94_vm0, %v65_v32, 0.0  ;;  %v4264_v44 = vcvt.s32.f32 %v2678_v40  ;;  %v2737_v59 = vld [vmem:[%s4237_s0 + $0xa8] sm:$0xff]  ;;  %v2750_v10 = vld [vmem:[%s4237_s0 + $0xb0] sm:$0xff]  ;;  %v2755_v11 = vld [vmem:[%s4237_s0 + $0xb8] sm:$0xff] }
   0x9   :  { %99 = vadd.xlane.f32.xlu0 %v98_v12  ;;  %105 = vadd.xlane.f32.xlu1 %v104_v13  ;;  %v128_v37 = vsel %vm94_vm0, %v66_v33, 0.0  ;;  %v131_v42 = vsel %vm94_vm0, %v67_v38, 0.0  ;;  %v134_v43 = vsel %vm94_vm0, %v4265_v39, 0.0  ;;  %v4262_v45 = vcvt.s32.f32 %v2683_v41  ;;  %vm2370_vm6 = vmpackc.low %vm794_vm2, %vm2529_vm5 }
   0xa   :  { %v137_v48 = vsel %vm94_vm0, %v4264_v44, 0.0  ;;  %v4261_v50 = vcvt.s32.f32 %v2696_v46  ;;  %v4259_v51 = vcvt.s32.f32 %v2701_v47  ;;  %v4257_v56 = vcvt.s32.f32 %v2714_v52 }
   0xb   :  { %v140_v49 = vsel %vm94_vm0, %v4262_v45, 0.0  ;;  %v4254_v57 = vcvt.s32.f32 %v2719_v53  ;;  %v4253_v62 = vcvt.s32.f32 %v2732_v58  ;;  %v4250_v63 = vcvt.s32.f32 %v2737_v59 }
   0xc   :  { %v143_v54 = vsel %vm94_vm0, %v4261_v50, 0.0  ;;  %v146_v55 = vsel %vm94_vm0, %v4259_v51, 0.0  ;;  %v149_v60 = vsel %vm94_vm0, %v4257_v56, 0.0 }
   0xd   :  { %108 = vadd.xlane.f32.xlu0 %v107_v18  ;;  %111 = vadd.xlane.f32.xlu1 %v110_v19  ;;  %v152_v61 = vsel %vm94_vm0, %v4254_v57, 0.0  ;;  %v155_v12 = vsel %vm94_vm0, %v4253_v62, 0.0  ;;  %v158_v13 = vsel %vm94_vm0, %v4250_v63, 0.0  ;;  %v4249_v18 = vcvt.s32.f32 %v2750_v10  ;;  %v2858_v63 = vld [vmem:[%s4237_s0 + $0x110] sm:$0xff]  ;;  %v2876_v57 = vld [vmem:[%s4237_s0 + $0x120] sm:$0xff] }
   0xe   :  { %v4246_v19 = vcvt.s32.f32 %v2755_v11 }
  0x11   :  { %114 = vadd.xlane.f32.xlu0 %v113_v24  ;;  %117 = vadd.xlane.f32.xlu1 %v116_v25  ;;  %v2768_v24 = vld [vmem:[%s4237_s0 + $0xc0] sm:$0xff]  ;;  %v2773_v25 = vld [vmem:[%s4237_s0 + $0xc8] sm:$0xff] }
  0x15   :  { %120 = vadd.xlane.f32.xlu0 %v119_v30  ;;  %123 = vadd.xlane.f32.xlu1 %v122_v31  ;;  %v161_v30 = vsel %vm94_vm0, %v4249_v18, 0.0  ;;  %v164_v31 = vsel %vm94_vm0, %v4246_v19, 0.0  ;;  %v2840_v19 = vld [vmem:[%s4237_s0 + $0x100] sm:$0xff] }
  0x19   :  { %126 = vadd.xlane.f32.xlu0 %v125_v36  ;;  %129 = vadd.xlane.f32.xlu1 %v128_v37  ;;  %v4245_v36 = vcvt.s32.f32 %v2768_v24  ;;  %v4242_v37 = vcvt.s32.f32 %v2773_v25 }
  0x1d   :  { %132 = vadd.xlane.f32.xlu0 %v131_v42  ;;  %135 = vadd.xlane.f32.xlu1 %v134_v43  ;;  %v2786_v42 = vld [vmem:[%s4237_s0 + $0xd0] sm:$0xff]  ;;  %v2791_v43 = vld [vmem:[%s4237_s0 + $0xd8] sm:$0xff] }
  0x21   :  { %138 = vadd.xlane.f32.xlu0 %v137_v48  ;;  %141 = vadd.xlane.f32.xlu1 %v140_v49  ;;  %v167_v48 = vsel %vm94_vm0, %v4245_v36, 0.0  ;;  %v170_v49 = vsel %vm94_vm0, %v4242_v37, 0.0  ;;  %v2822_v37 = vld [vmem:[%s4237_s0 + $0xf0] sm:$0xff] }
  0x25   :  { %144 = vadd.xlane.f32.xlu0 %v143_v54  ;;  %147 = vadd.xlane.f32.xlu1 %v146_v55  ;;  %v4244_v54 = vcvt.s32.f32 %v2786_v42  ;;  %v4243_v55 = vcvt.s32.f32 %v2791_v43 }
  0x29   :  { %150 = vadd.xlane.f32.xlu0 %v149_v60  ;;  %153 = vadd.xlane.f32.xlu1 %v152_v61  ;;  %v2804_v60 = vld [vmem:[%s4237_s0 + $0xe0] sm:$0xff]  ;;  %v2809_v61 = vld [vmem:[%s4237_s0 + $0xe8] sm:$0xff] }
  0x2d   :  { %156 = vadd.xlane.f32.xlu0 %v155_v12  ;;  %159 = vadd.xlane.f32.xlu1 %v158_v13  ;;  %v173_v12 = vsel %vm94_vm0, %v4244_v54, 0.0  ;;  %v176_v13 = vsel %vm94_vm0, %v4243_v55, 0.0  ;;  %v4252_v54 = vcvt.s32.f32 %v2822_v37 }
  0x31   :  { %162 = vadd.xlane.f32.xlu0 %v161_v30  ;;  %165 = vadd.xlane.f32.xlu1 %v164_v31  ;;  %v4248_v30 = vcvt.s32.f32 %v2804_v60  ;;  %v4247_v31 = vcvt.s32.f32 %v2809_v61 }
  0x33   :  { %v182_v55 = vsel %vm94_vm0, %v4247_v31, 0.0 }
  0x35   :  { %168 = vadd.xlane.f32.xlu0 %v167_v48  ;;  %171 = vadd.xlane.f32.xlu1 %v170_v49  ;;  %v2827_v48 = vld [vmem:[%s4237_s0 + $0xf8] sm:$0xff]  ;;  %v179_v49 = vsel %vm94_vm0, %v4248_v30, 0.0  ;;  %v4256_v30 = vcvt.s32.f32 %v2840_v19 }
  0x36   :  { %v4251_v36 = vcvt.s32.f32 %v2827_v48 }
  0x38   :  { %v188_v31 = vsel %vm94_vm0, %v4251_v36, 0.0 }
  0x39   :  { %174 = vadd.xlane.f32.xlu0 %v173_v12  ;;  %177 = vadd.xlane.f32.xlu1 %v176_v13  ;;  %v2845_v12 = vld [vmem:[%s4237_s0 + $0x108] sm:$0xff]  ;;  %v185_v13 = vsel %vm94_vm0, %v4252_v54, 0.0  ;;  %v4258_v54 = vcvt.s32.f32 %v2858_v63 }
  0x3a   :  { %v4255_v18 = vcvt.s32.f32 %v2845_v12 }
  0x3c   :  { %v194_v36 = vsel %vm94_vm0, %v4255_v18, 0.0 }
  0x3d   :  { %180 = vadd.xlane.f32.xlu0 %v179_v49  ;;  %183 = vadd.xlane.f32.xlu1 %v182_v55  ;;  %v2863_v55 = vld [vmem:[%s4237_s0 + $0x118] sm:$0xff]  ;;  %v191_v49 = vsel %vm94_vm0, %v4256_v30, 0.0  ;;  %v4263_v30 = vcvt.s32.f32 %v2876_v57 }
  0x3e   :  { %v4260_v62 = vcvt.s32.f32 %v2863_v55 }
  0x40   :  { %v200_v18 = vsel %vm94_vm0, %v4260_v62, 0.0 }
  0x41   :  { %186 = vadd.xlane.f32.xlu0 %v185_v13  ;;  %189 = vadd.xlane.f32.xlu1 %v188_v31  ;;  %v2881_v31 = vld [vmem:[%s4237_s0 + $0x128] sm:$0xf]  ;;  %v197_v13 = vsel %vm94_vm0, %v4258_v54, 0.0 }
  0x42   :  { %v92_v56 = vcvt.s32.f32 %v2881_v31 }
  0x45   :  { %192 = vadd.xlane.f32.xlu0 %v191_v49  ;;  %195 = vadd.xlane.f32.xlu1 %v194_v36  ;;  %v203_v49 = vsel %vm94_vm0, %v4263_v30, 0.0  ;;  %v207_v36 = vsel %vm206_vm1, %v92_v56, 0.0 }
  0x49   :  { %198 = vadd.xlane.f32.xlu0 %v197_v13  ;;  %201 = vadd.xlane.f32.xlu1 %v200_v18 }
  0x4d   :  { %204 = vadd.xlane.f32.xlu0 %v203_v49  ;;  %208 = vadd.xlane.f32.xlu1 %v207_v36 }
  0x92   :  { %v97_v54 = vpop.xlane.xlu0 %96  ;;  %v103_v51 = vpop.xlane.xlu1 %102 }
  0x93   :  { %v211_v62 = vmul.f32 0.25, %v97_v54  ;;  %v213_v50 = vmul.f32 0.25, %v103_v51 }
  0x95   :  { %v2899_v45 = vsub.f32 %v55_v3, %v211_v62  ;;  %v2903_v18 = vsub.f32 %v57_v4, %v213_v50 }
  0x96   :  { %v100_v13 = vpop.xlane.xlu0 %99  ;;  %v106_v30 = vpop.xlane.xlu1 %105 }
  0x97   :  { %v212_v44 = vmul.f32 0.25, %v100_v13  ;;  %v214_v39 = vmul.f32 0.25, %v106_v30  ;;  %v287_v49 = vmul.f32 %v2899_v45, %v2899_v45  ;;  %v289_v36 = vmul.f32 %v2903_v18, %v2903_v18 }
  0x99   :  { %v2911_v51 = vsub.f32 %v56_v5, %v212_v44  ;;  %v2915_v0 = vsub.f32 %v58_v7, %v214_v39  ;;  %v325_v1 = vsel %vm94_vm0, %v287_v49, 0.0  ;;  %v331_v50 = vsel %vm94_vm0, %v289_v36, 0.0 }
  0x9a   :  { %326 = vadd.xlane.f32.xlu0 %v325_v1  ;;  %v109_v3 = vpop.xlane.xlu0 %108  ;;  %v112_v4 = vpop.xlane.xlu1 %111 }
  0x9b   :  { %v215_v62 = vmul.f32 0.25, %v109_v3  ;;  %v216_v54 = vmul.f32 0.25, %v112_v4  ;;  %v288_v30 = vmul.f32 %v2911_v51, %v2911_v51  ;;  %v290_v2 = vmul.f32 %v2915_v0, %v2915_v0 }
  0x9d   :  { %v2925_v5 = vsub.f32 %v59_v14, %v215_v62  ;;  %v2929_v6 = vsub.f32 %v60_v15, %v216_v54  ;;  %v328_v7 = vsel %vm94_vm0, %v288_v30, 0.0  ;;  %v334_v13 = vsel %vm94_vm0, %v290_v2, 0.0 }
  0x9e   :  { %332 = vadd.xlane.f32.xlu0 %v331_v50  ;;  %329 = vadd.xlane.f32.xlu1 %v328_v7  ;;  %v115_v39 = vpop.xlane.xlu0 %114  ;;  %v118_v44 = vpop.xlane.xlu1 %117 }
  0x9f   :  { %v217_v49 = vmul.f32 0.25, %v115_v39  ;;  %v218_v36 = vmul.f32 0.25, %v118_v44  ;;  %v291_v1 = vmul.f32 %v2925_v5, %v2925_v5  ;;  %v292_v8 = vmul.f32 %v2929_v6, %v2929_v6 }
  0xa1   :  { %v2939_v9 = vsub.f32 %v61_v20, %v217_v49  ;;  %v2943_v14 = vsub.f32 %v62_v21, %v218_v36  ;;  %v337_v15 = vsel %vm94_vm0, %v291_v1, 0.0  ;;  %v340_v50 = vsel %vm94_vm0, %v292_v8, 0.0 }
  0xa2   :  { %335 = vadd.xlane.f32.xlu1 %v334_v13  ;;  %338 = vadd.xlane.f32.xlu0 %v337_v15  ;;  %v121_v3 = vpop.xlane.xlu0 %120  ;;  %v124_v4 = vpop.xlane.xlu1 %123 }
  0xa3   :  { %v219_v62 = vmul.f32 0.25, %v121_v3  ;;  %v220_v54 = vmul.f32 0.25, %v124_v4  ;;  %v293_v30 = vmul.f32 %v2939_v9, %v2939_v9  ;;  %v294_v16 = vmul.f32 %v2943_v14, %v2943_v14 }
  0xa5   :  { %v2953_v17 = vsub.f32 %v63_v26, %v219_v62  ;;  %v2957_v20 = vsub.f32 %v64_v27, %v220_v54  ;;  %v343_v21 = vsel %vm94_vm0, %v293_v30, 0.0  ;;  %v346_v39 = vsel %vm94_vm0, %v294_v16, 0.0 }
  0xa6   :  { %341 = vadd.xlane.f32.xlu1 %v340_v50  ;;  %344 = vadd.xlane.f32.xlu0 %v343_v21  ;;  %v127_v2 = vpop.xlane.xlu0 %126  ;;  %v130_v7 = vpop.xlane.xlu1 %129 }
  0xa7   :  { %v221_v44 = vmul.f32 0.25, %v127_v2  ;;  %v222_v13 = vmul.f32 0.25, %v130_v7  ;;  %v295_v49 = vmul.f32 %v2953_v17, %v2953_v17  ;;  %v296_v22 = vmul.f32 %v2957_v20, %v2957_v20 }
  0xa8   :  { %v4293_v7 = vcvt.s32.f32 %v2683_v41  ;;  %v4294_v41 = vcvt.s32.f32 %v2696_v46 }
  0xa9   :  { %v2967_v23 = vsub.f32 %v65_v32, %v221_v44  ;;  %v2971_v26 = vsub.f32 %v66_v33, %v222_v13  ;;  %v349_v27 = vsel %vm94_vm0, %v295_v49, 0.0  ;;  %v352_v8 = vsel %vm94_vm0, %v296_v22, 0.0 }
  0xaa   :  { %347 = vadd.xlane.f32.xlu1 %v346_v39  ;;  %350 = vadd.xlane.f32.xlu0 %v349_v27  ;;  %v133_v36 = vpop.xlane.xlu0 %132  ;;  %v136_v1 = vpop.xlane.xlu1 %135  ;;  %v4291_v32 = vcvt.s32.f32 %v2665_v35  ;;  %v4292_v35 = vcvt.s32.f32 %v2678_v40 }
  0xab   :  { %v223_v15 = vmul.f32 0.25, %v133_v36  ;;  %v224_v3 = vmul.f32 0.25, %v136_v1  ;;  %v297_v4 = vmul.f32 %v2967_v23, %v2967_v23  ;;  %v298_v28 = vmul.f32 %v2971_v26, %v2971_v26 }
  0xad   :  { %v2981_v29 = vsub.f32 %v67_v38, %v223_v15  ;;  %v2985_v33 = vsub.f32 %v4291_v32, %v224_v3  ;;  %v355_v50 = vsel %vm94_vm0, %v297_v4, 0.0  ;;  %v358_v30 = vsel %vm94_vm0, %v298_v28, 0.0 }
  0xae   :  { %353 = vadd.xlane.f32.xlu1 %v352_v8  ;;  %356 = vadd.xlane.f32.xlu0 %v355_v50  ;;  %v139_v62 = vpop.xlane.xlu0 %138  ;;  %v142_v54 = vpop.xlane.xlu1 %141  ;;  %v4295_v15 = vcvt.s32.f32 %v2701_v47  ;;  %v4296_v47 = vcvt.s32.f32 %v2714_v52 }
  0xaf   :  { %v225_v16 = vmul.f32 0.25, %v139_v62  ;;  %v226_v21 = vmul.f32 0.25, %v142_v54  ;;  %v299_v2 = vmul.f32 %v2981_v29, %v2981_v29  ;;  %v300_v34 = vmul.f32 %v2985_v33, %v2985_v33 }
  0xb1   :  { %v2995_v38 = vsub.f32 %v4292_v35, %v225_v16  ;;  %v2999_v39 = vsub.f32 %v4293_v7, %v226_v21  ;;  %v361_v44 = vsel %vm94_vm0, %v299_v2, 0.0  ;;  %v364_v22 = vsel %vm94_vm0, %v300_v34, 0.0 }
  0xb2   :  { %359 = vadd.xlane.f32.xlu1 %v358_v30  ;;  %362 = vadd.xlane.f32.xlu0 %v361_v44  ;;  %v145_v13 = vpop.xlane.xlu0 %144  ;;  %v148_v49 = vpop.xlane.xlu1 %147  ;;  %v4297_v21 = vcvt.s32.f32 %v2719_v53  ;;  %v4298_v53 = vcvt.s32.f32 %v2732_v58 }
  0xb3   :  { %v227_v27 = vmul.f32 0.25, %v145_v13  ;;  %v228_v36 = vmul.f32 0.25, %v148_v49  ;;  %v301_v1 = vmul.f32 %v2995_v38, %v2995_v38  ;;  %v302_v40 = vmul.f32 %v2999_v39, %v2999_v39 }
  0xb5   :  { %v3009_v8 = vsub.f32 %v4294_v41, %v227_v27  ;;  %v3013_v3 = vsub.f32 %v4295_v15, %v228_v36  ;;  %v367_v4 = vsel %vm94_vm0, %v301_v1, 0.0  ;;  %v370_v50 = vsel %vm94_vm0, %v302_v40, 0.0 }
  0xb6   :  { %365 = vadd.xlane.f32.xlu1 %v364_v22  ;;  %368 = vadd.xlane.f32.xlu0 %v367_v4  ;;  %v151_v28 = vpop.xlane.xlu0 %150  ;;  %v154_v32 = vpop.xlane.xlu1 %153  ;;  %v4299_v36 = vcvt.s32.f32 %v2737_v59  ;;  %v675_v59 = vld [vmem:[%s4238_s2] sm:$0xf] }
  0xb7   :  { %v229_v62 = vmul.f32 0.25, %v151_v28  ;;  %v230_v54 = vmul.f32 0.25, %v154_v32  ;;  %v303_v30 = vmul.f32 %v3009_v8, %v3009_v8  ;;  %v304_v46 = vmul.f32 %v3013_v3, %v3013_v3  ;;  %2249 = vmatprep.subr.msk.mxu0 %vm794_vm2, %v675_v59 }
  0xb8   :  { %2250 = vmatpush3.msk.msra.mxu0 %vm794_vm2, %v675_v59 }
  0xb9   :  { %v3023_v16 = vsub.f32 %v4296_v47, %v229_v62  ;;  %v3027_v2 = vsub.f32 %v4297_v21, %v230_v54  ;;  %v373_v34 = vsel %vm94_vm0, %v303_v30, 0.0  ;;  %v376_v44 = vsel %vm94_vm0, %v304_v46, 0.0 }
  0xba   :  { %371 = vadd.xlane.f32.xlu1 %v370_v50  ;;  %374 = vadd.xlane.f32.xlu0 %v373_v34  ;;  %v157_v35 = vpop.xlane.xlu0 %156  ;;  %v160_v7 = vpop.xlane.xlu1 %159  ;;  %v4300_v62 = vcvt.s32.f32 %v2750_v10  ;;  %v4301_v30 = vcvt.s32.f32 %v2755_v11 }
  0xbb   :  { %v231_v13 = vmul.f32 0.25, %v157_v35  ;;  %v232_v49 = vmul.f32 0.25, %v160_v7  ;;  %v305_v22 = vmul.f32 %v3023_v16, %v3023_v16  ;;  %v306_v52 = vmul.f32 %v3027_v2, %v3027_v2 }
  0xbd   :  { %v3037_v27 = vsub.f32 %v4298_v53, %v231_v13  ;;  %v3041_v1 = vsub.f32 %v4299_v36, %v232_v49  ;;  %v379_v40 = vsel %vm94_vm0, %v305_v22, 0.0  ;;  %v382_v4 = vsel %vm94_vm0, %v306_v52, 0.0 }
  0xbe   :  { %377 = vadd.xlane.f32.xlu1 %v376_v44  ;;  %380 = vadd.xlane.f32.xlu0 %v379_v40  ;;  %v163_v41 = vpop.xlane.xlu0 %162  ;;  %v166_v15 = vpop.xlane.xlu1 %165  ;;  %v4302_v13 = vcvt.s32.f32 %v2768_v24  ;;  %v4303_v22 = vcvt.s32.f32 %v2773_v25  ;;  %v4304_v25 = vcvt.s32.f32 %v2786_v42 }
  0xbf   :  { %v233_v28 = vmul.f32 0.25, %v163_v41  ;;  %v234_v32 = vmul.f32 0.25, %v166_v15  ;;  %v307_v50 = vmul.f32 %v3037_v27, %v3037_v27  ;;  %v308_v58 = vmul.f32 %v3041_v1, %v3041_v1 }
  0xc1   :  { %v3054_v54 = vsub.f32 %v4300_v62, %v233_v28  ;;  %v3058_v46 = vsub.f32 %v4301_v30, %v234_v32  ;;  %v385_v47 = vsel %vm94_vm0, %v307_v50, 0.0  ;;  %v388_v35 = vsel %vm94_vm0, %v308_v58, 0.0 }
  0xc2   :  { %383 = vadd.xlane.f32.xlu1 %v382_v4  ;;  %386 = vadd.xlane.f32.xlu0 %v385_v47  ;;  %v169_v21 = vpop.xlane.xlu0 %168  ;;  %v172_v34 = vpop.xlane.xlu1 %171  ;;  %v4305_v50 = vcvt.s32.f32 %v2791_v43  ;;  %v4306_v43 = vcvt.s32.f32 %v2804_v60 }
  0xc3   :  { %v235_v7 = vmul.f32 0.25, %v169_v21  ;;  %v236_v44 = vmul.f32 0.25, %v172_v34  ;;  %v309_v10 = vmul.f32 %v3054_v54, %v3054_v54  ;;  %v310_v11 = vmul.f32 %v3058_v46, %v3058_v46 }
  0xc5   :  { %v3070_v49 = vsub.f32 %v4302_v13, %v235_v7  ;;  %v3074_v52 = vsub.f32 %v4303_v22, %v236_v44  ;;  %v391_v53 = vsel %vm94_vm0, %v309_v10, 0.0  ;;  %v394_v41 = vsel %vm94_vm0, %v310_v11, 0.0 }
  0xc6   :  { %389 = vadd.xlane.f32.xlu1 %v388_v35  ;;  %392 = vadd.xlane.f32.xlu0 %v391_v53  ;;  %v175_v36 = vpop.xlane.xlu0 %174  ;;  %v178_v40 = vpop.xlane.xlu1 %177  ;;  %v4307_v44 = vcvt.s32.f32 %v2809_v61  ;;  %v4308_v61 = vcvt.s32.f32 %v2822_v37 }
  0xc7   :  { %v237_v15 = vmul.f32 0.25, %v175_v36  ;;  %v238_v4 = vmul.f32 0.25, %v178_v40  ;;  %v311_v28 = vmul.f32 %v3070_v49, %v3070_v49  ;;  %v312_v24 = vmul.f32 %v3074_v52, %v3074_v52 }
  0xc9   :  { %v3084_v32 = vsub.f32 %v4304_v25, %v237_v15  ;;  %v3088_v58 = vsub.f32 %v4305_v50, %v238_v4  ;;  %v397_v59 = vsel %vm94_vm0, %v311_v28, 0.0  ;;  %v400_v47 = vsel %vm94_vm0, %v312_v24, 0.0 }
  0xca   :  { %395 = vadd.xlane.f32.xlu1 %v394_v41  ;;  %398 = vadd.xlane.f32.xlu0 %v397_v59  ;;  %v181_v62 = vpop.xlane.xlu0 %180  ;;  %v184_v30 = vpop.xlane.xlu1 %183  ;;  %v4309_v4 = vcvt.s32.f32 %v2827_v48  ;;  %v4310_v48 = vcvt.s32.f32 %v2840_v19 }
  0xcb   :  { %v239_v21 = vmul.f32 0.25, %v181_v62  ;;  %v240_v34 = vmul.f32 0.25, %v184_v30  ;;  %v313_v35 = vmul.f32 %v3084_v32, %v3084_v32  ;;  %v314_v42 = vmul.f32 %v3088_v58, %v3088_v58 }
  0xcd   :  { %v3098_v7 = vsub.f32 %v4306_v43, %v239_v21  ;;  %v3102_v10 = vsub.f32 %v4307_v44, %v240_v34  ;;  %v403_v11 = vsel %vm94_vm0, %v313_v35, 0.0  ;;  %v406_v53 = vsel %vm94_vm0, %v314_v42, 0.0 }
  0xce   :  { %401 = vadd.xlane.f32.xlu1 %v400_v47  ;;  %404 = vadd.xlane.f32.xlu0 %v403_v11  ;;  %v187_v13 = vpop.xlane.xlu0 %186  ;;  %v190_v22 = vpop.xlane.xlu1 %189  ;;  %v4311_v34 = vcvt.s32.f32 %v2845_v12  ;;  %v4312_v12 = vcvt.s32.f32 %v2858_v63 }
  0xcf   :  { %v241_v36 = vmul.f32 0.25, %v187_v13  ;;  %v242_v40 = vmul.f32 0.25, %v190_v22  ;;  %v315_v41 = vmul.f32 %v3098_v7, %v3098_v7  ;;  %v316_v60 = vmul.f32 %v3102_v10, %v3102_v10 }
  0xd1   :  { %v3112_v15 = vsub.f32 %v4308_v61, %v241_v36  ;;  %v3116_v28 = vsub.f32 %v4309_v4, %v242_v40  ;;  %v409_v24 = vsel %vm94_vm0, %v315_v41, 0.0  ;;  %v412_v59 = vsel %vm94_vm0, %v316_v60, 0.0 }
  0xd2   :  { %407 = vadd.xlane.f32.xlu1 %v406_v53  ;;  %410 = vadd.xlane.f32.xlu0 %v409_v24  ;;  %v193_v25 = vpop.xlane.xlu0 %192  ;;  %v196_v50 = vpop.xlane.xlu1 %195  ;;  %v4313_v40 = vcvt.s32.f32 %v2863_v55  ;;  %v4314_v55 = vcvt.s32.f32 %v2876_v57 }
  0xd3   :  { %v243_v62 = vmul.f32 0.25, %v193_v25  ;;  %v244_v30 = vmul.f32 0.25, %v196_v50  ;;  %v317_v47 = vmul.f32 %v3112_v15, %v3112_v15  ;;  %v318_v37 = vmul.f32 %v3116_v28, %v3116_v28 }
  0xd5   :  { %v3126_v21 = vsub.f32 %v4310_v48, %v243_v62  ;;  %v3130_v35 = vsub.f32 %v4311_v34, %v244_v30  ;;  %v415_v42 = vsel %vm94_vm0, %v317_v47, 0.0  ;;  %v418_v11 = vsel %vm94_vm0, %v318_v37, 0.0 }
  0xd6   :  { %413 = vadd.xlane.f32.xlu1 %v412_v59  ;;  %416 = vadd.xlane.f32.xlu0 %v415_v42  ;;  %v199_v43 = vpop.xlane.xlu0 %198  ;;  %v202_v44 = vpop.xlane.xlu1 %201 }
  0xd7   :  { %v245_v13 = vmul.f32 0.25, %v199_v43  ;;  %v246_v22 = vmul.f32 0.25, %v202_v44  ;;  %v319_v53 = vmul.f32 %v3126_v21, %v3126_v21  ;;  %v320_v19 = vmul.f32 %v3130_v35, %v3130_v35 }
  0xd8   :  { %v591_v43 = vlaneseq }
  0xd9   :  { %v3140_v36 = vsub.f32 %v4312_v12, %v245_v13  ;;  %v3144_v41 = vsub.f32 %v4313_v40, %v246_v22  ;;  %v421_v60 = vsel %vm94_vm0, %v319_v53, 0.0  ;;  %v424_v24 = vsel %vm94_vm0, %v320_v19, 0.0 }
  0xda   :  { %419 = vadd.xlane.f32.xlu1 %v418_v11  ;;  %422 = vadd.xlane.f32.xlu0 %v421_v60  ;;  %v205_v61 = vpop.xlane.xlu0 %204  ;;  %v209_v4 = vpop.xlane.xlu1 %208  ;;  %v3168_v19 = vshrl.u32 %v591_v43, 7 }
  0xdb   :  { %v247_v25 = vmul.f32 0.25, %v205_v61  ;;  %v248_v50 = vmul.f32 0.25, %v209_v4  ;;  %v321_v59 = vmul.f32 %v3140_v36, %v3140_v36  ;;  %v322_v63 = vmul.f32 %v3144_v41, %v3144_v41 }
  0xdd   :  { %v3154_v62 = vsub.f32 %v4314_v55, %v247_v25  ;;  %v3158_v30 = vsub.f32 %v92_v56, %v248_v50  ;;  %v427_v47 = vsel %vm94_vm0, %v321_v59, 0.0  ;;  %v430_v37 = vsel %vm94_vm0, %v322_v63, 0.0  ;;  %v3174_v63 = vld [vmem:[%s4239_s1] sm:$0xff] }
  0xde   :  { %425 = vadd.xlane.f32.xlu1 %v424_v24  ;;  %428 = vadd.xlane.f32.xlu0 %v427_v47  ;;  %v593_v25 = vsub.s32 0, %v3168_v19 }
  0xdf   :  { %v323_v48 = vmul.f32 %v3154_v62, %v3154_v62  ;;  %v324_v34 = vmul.f32 %v3158_v30, %v3158_v30 }
  0xe1   :  { %v433_v57 = vsel %vm94_vm0, %v323_v48, 0.0  ;;  %v436_v31 = vsel %vm206_vm1, %v324_v34, 0.0 }
  0xe2   :  { %431 = vadd.xlane.f32.xlu1 %v430_v37  ;;  %434 = vadd.xlane.f32.xlu0 %v433_v57  ;;  %v635_v37 = vsub.s32 1, %v3168_v19  ;;  %v3178_v57 = vrot.slane %v3174_v63, %v593_v25 }
  0xe6   :  { %437 = vadd.xlane.f32.xlu1 %v436_v31 }
 0x127   :  { %v327_v56 = vpop.xlane.xlu0 %326 }
 0x128   :  { %v439_v42 = vmul.f32 0.25, %v327_v56 }
 0x12a   :  { %v477_v44 = vadd.f32 1e-05, %v439_v42 }
 0x12b   :  { %v330_v11 = vpop.xlane.xlu1 %329  ;;  %v333_v13 = vpop.xlane.xlu0 %332 }
 0x12c   :  { %2376 = vrsqrt.f32 %v477_v44  ;;  %v440_v22 = vmul.f32 0.25, %v330_v11  ;;  %v441_v53 = vmul.f32 0.25, %v333_v13  ;;  %v3182_v13 = vrot.slane %v3174_v63, %v635_v37 }
 0x12e   :  { %v478_v12 = vadd.f32 1e-05, %v440_v22  ;;  %v479_v40 = vadd.f32 1e-05, %v441_v53 }
 0x12f   :  { %v336_v60 = vpop.xlane.xlu1 %335  ;;  %v339_v61 = vpop.xlane.xlu0 %338 }
 0x130   :  { %2378 = vrsqrt.f32 %v478_v12  ;;  %v442_v4 = vmul.f32 0.25, %v336_v60  ;;  %v443_v24 = vmul.f32 0.25, %v339_v61 }
 0x131   :  { %2380 = vrsqrt.f32 %v479_v40 }
 0x132   :  { %v480_v50 = vadd.f32 1e-05, %v442_v4  ;;  %v481_v59 = vadd.f32 1e-05, %v443_v24 }
 0x133   :  { %v342_v55 = vpop.xlane.xlu1 %341  ;;  %v345_v47 = vpop.xlane.xlu0 %344 }
 0x134   :  { %2382 = vrsqrt.f32 %v480_v50  ;;  %v444_v48 = vmul.f32 0.25, %v342_v55  ;;  %v445_v34 = vmul.f32 0.25, %v345_v47 }
 0x135   :  { %2384 = vrsqrt.f32 %v481_v59 }
 0x136   :  { %v2377_v31 = vpop.eup %2376  ;;  %v482_v56 = vadd.f32 1e-05, %v444_v48  ;;  %v483_v42 = vadd.f32 1e-05, %v445_v34 }
 0x137   :  { %v348_v43 = vpop.xlane.xlu1 %347  ;;  %v351_v44 = vpop.xlane.xlu0 %350  ;;  %v553_v11 = vmul.f32 %v2377_v31, %v2899_v45 }
 0x138   :  { %2386 = vrsqrt.f32 %v482_v56  ;;  %v446_v22 = vmul.f32 0.25, %v348_v43  ;;  %v447_v53 = vmul.f32 0.25, %v351_v44 }
 0x139   :  { %2388 = vrsqrt.f32 %v483_v42  ;;  %v595_v12 = vmul.f32 %v3178_v57, %v553_v11 }
 0x13a   :  { %v2379_v40 = vpop.eup %2378  ;;  %v484_v60 = vadd.f32 1e-05, %v446_v22  ;;  %v485_v61 = vadd.f32 1e-05, %v447_v53 }
 0x13b   :  { %v2381_v4 = vpop.eup %2380  ;;  %v354_v24 = vpop.xlane.xlu1 %353  ;;  %v637_v50 = vadd.f32 %v3182_v13, %v595_v12  ;;  %v554_v59 = vmul.f32 %v2379_v40, %v2911_v51 }
 0x13c   :  { %v357_v25 = vpop.xlane.xlu0 %356  ;;  %2390 = vrsqrt.f32 %v484_v60  ;;  %v448_v45 = vmul.f32 0.25, %v354_v24  ;;  %v555_v47 = vmul.f32 %v2381_v4, %v2903_v18 }
 0x13d   :  { %v449_v55 = vmul.f32 0.25, %v357_v25  ;;  %2392 = vrsqrt.f32 %v485_v61  ;;  %2251 = vmatprep.mubr.msk.f32.mxu0 %vm94_vm0, %v637_v50  ;;  %v596_v37 = vmul.f32 %v3178_v57, %v554_v59 }
 0x13e   :  { %v2383_v48 = vpop.eup %2382  ;;  %v486_v34 = vadd.f32 1e-05, %v448_v45  ;;  %v597_v56 = vmul.f32 %v3178_v57, %v555_v47 }
 0x13f   :  { %v487_v31 = vadd.f32 1e-05, %v449_v55  ;;  %v2385_v42 = vpop.eup %2384  ;;  %v360_v43 = vpop.xlane.xlu1 %359  ;;  %v638_v51 = vadd.f32 %v3182_v13, %v596_v37  ;;  %v556_v11 = vmul.f32 %v2383_v48, %v2915_v0 }
 0x140   :  { %v363_v44 = vpop.xlane.xlu0 %362  ;;  %2394 = vrsqrt.f32 %v486_v34  ;;  %v450_v22 = vmul.f32 0.25, %v360_v43  ;;  %v639_v53 = vadd.f32 %v3182_v13, %v597_v56  ;;  %v557_v40 = vmul.f32 %v2385_v42, %v2925_v5 }
 0x141   :  { %v451_v18 = vmul.f32 0.25, %v363_v44  ;;  %2396 = vrsqrt.f32 %v487_v31  ;;  %2252 = vmatmul.mubr.msk.f32.vlgmr.msra.gmra.mrb[0].mxu0 %vm94_vm0, %v638_v51  ;;  %v598_v12 = vmul.f32 %v3178_v57, %v556_v11 }
 0x142   :  { %v2387_v60 = vpop.eup %2386  ;;  %v488_v61 = vadd.f32 1e-05, %v450_v22  ;;  %2254 = vmatprep.mubr.msk.f32.mxu0 %vm94_vm0, %v639_v53  ;;  %v599_v59 = vmul.f32 %v3178_v57, %v557_v40 }
 0x143   :  { %v489_v4 = vadd.f32 1e-05, %v451_v18  ;;  %v2389_v24 = vpop.eup %2388  ;;  %v366_v25 = vpop.xlane.xlu1 %365  ;;  %v640_v50 = vadd.f32 %v3182_v13, %v598_v12  ;;  %v558_v45 = vmul.f32 %v2387_v60, %v2929_v6 }
 0x144   :  { %v369_v0 = vpop.xlane.xlu0 %368  ;;  %2398 = vrsqrt.f32 %v488_v61  ;;  %v452_v55 = vmul.f32 0.25, %v366_v25  ;;  %v559_v37 = vmul.f32 %v2389_v24, %v2939_v9  ;;  %v641_v5 = vadd.f32 %v3182_v13, %v599_v59 }
 0x145   :  { %v453_v47 = vmul.f32 0.25, %v369_v0  ;;  %2400 = vrsqrt.f32 %v489_v4  ;;  %2255 = vmatmul.mubr.msk.f32.gmra.mrb[2].mxu0 %vm94_vm0, %v640_v50  ;;  %v600_v48 = vmul.f32 %v3178_v57, %v558_v45 }
 0x146   :  { %v2391_v34 = vpop.eup %2390  ;;  %v490_v31 = vadd.f32 1e-05, %v452_v55  ;;  %v601_v42 = vmul.f32 %v3178_v57, %v559_v37  ;;  %2257 = vmatprep.mubr.msk.f32.mxu0 %vm94_vm0, %v641_v5 }
 0x147   :  { %v491_v56 = vadd.f32 1e-05, %v453_v47  ;;  %v2393_v43 = vpop.eup %2392  ;;  %v372_v6 = vpop.xlane.xlu1 %371  ;;  %v642_v51 = vadd.f32 %v3182_v13, %v600_v48  ;;  %v560_v9 = vmul.f32 %v2391_v34, %v2943_v14 }
 0x148   :  { %v375_v44 = vpop.xlane.xlu0 %374  ;;  %2402 = vrsqrt.f32 %v490_v31  ;;  %v454_v11 = vmul.f32 0.25, %v372_v6  ;;  %v643_v18 = vadd.f32 %v3182_v13, %v601_v42  ;;  %v561_v12 = vmul.f32 %v2393_v43, %v2953_v17 }
 0x149   :  { %v455_v22 = vmul.f32 0.25, %v375_v44  ;;  %2404 = vrsqrt.f32 %v491_v56  ;;  %2258 = vmatmul.mubr.msk.f32.gmra.mrb[4].mxu0 %vm94_vm0, %v642_v51  ;;  %v602_v53 = vmul.f32 %v3178_v57, %v560_v9 }
 0x14a   :  { %v2395_v40 = vpop.eup %2394  ;;  %v492_v60 = vadd.f32 1e-05, %v454_v11  ;;  %2260 = vmatprep.mubr.msk.f32.mxu0 %vm94_vm0, %v643_v18  ;;  %v603_v0 = vmul.f32 %v3178_v57, %v561_v12 }
 0x14b   :  { %v493_v61 = vadd.f32 1e-05, %v455_v22  ;;  %v2397_v4 = vpop.eup %2396  ;;  %v378_v24 = vpop.xlane.xlu1 %377  ;;  %v644_v25 = vadd.f32 %v3182_v13, %v602_v53  ;;  %v562_v50 = vmul.f32 %v2395_v40, %v2957_v20 }
 0x14c   :  { %v381_v14 = vpop.xlane.xlu0 %380  ;;  %2406 = vrsqrt.f32 %v492_v60  ;;  %v456_v59 = vmul.f32 0.25, %v378_v24  ;;  %v563_v55 = vmul.f32 %v2397_v4, %v2967_v23  ;;  %v645_v17 = vadd.f32 %v3182_v13, %v603_v0 }
 0x14d   :  { %v457_v45 = vmul.f32 0.25, %v381_v14  ;;  %2408 = vrsqrt.f32 %v493_v61  ;;  %2261 = vmatmul.mubr.msk.f32.gmra.mrb[6].mxu0 %vm94_vm0, %v644_v25  ;;  %v604_v47 = vmul.f32 %v3178_v57, %v562_v50 }
 0x14e   :  { %v2399_v37 = vpop.eup %2398  ;;  %v494_v5 = vadd.f32 1e-05, %v456_v59  ;;  %v605_v34 = vmul.f32 %v3178_v57, %v563_v55  ;;  %2263 = vmatprep.mubr.msk.f32.mxu0 %vm94_vm0, %v645_v17 }
 0x14f   :  { %v495_v48 = vadd.f32 1e-05, %v457_v45  ;;  %v2401_v31 = vpop.eup %2400  ;;  %v384_v20 = vpop.xlane.xlu1 %383  ;;  %v646_v42 = vadd.f32 %v3182_v13, %v604_v47  ;;  %v564_v23 = vmul.f32 %v2399_v37, %v2971_v26 }
 0x150   :  { %v387_v56 = vpop.xlane.xlu0 %386  ;;  %2410 = vrsqrt.f32 %v494_v5  ;;  %v458_v43 = vmul.f32 0.25, %v384_v20  ;;  %v647_v44 = vadd.f32 %v3182_v13, %v605_v34  ;;  %v565_v9 = vmul.f32 %v2401_v31, %v2981_v29 }
 0x151   :  { %v459_v6 = vmul.f32 0.25, %v387_v56  ;;  %2412 = vrsqrt.f32 %v495_v48  ;;  %2264 = vmatmul.mubr.msk.f32.gmra.mrb[8].mxu0 %vm94_vm0, %v646_v42  ;;  %v606_v51 = vmul.f32 %v3178_v57, %v564_v23 }
 0x152   :  { %v2403_v11 = vpop.eup %2402  ;;  %v496_v22 = vadd.f32 1e-05, %v458_v43  ;;  %2266 = vmatprep.mubr.msk.f32.mxu0 %vm94_vm0, %v647_v44  ;;  %v607_v60 = vmul.f32 %v3178_v57, %v565_v9 }
 0x153   :  { %v497_v18 = vadd.f32 1e-05, %v459_v6  ;;  %v2405_v53 = vpop.eup %2404  ;;  %v390_v12 = vpop.xlane.xlu1 %389  ;;  %v648_v40 = vadd.f32 %v3182_v13, %v606_v51  ;;  %v566_v61 = vmul.f32 %v2403_v11, %v2985_v33 }
 0x154   :  { %v393_v26 = vpop.xlane.xlu0 %392  ;;  %2414 = vrsqrt.f32 %v496_v22  ;;  %v460_v4 = vmul.f32 0.25, %v390_v12  ;;  %v567_v14 = vmul.f32 %v2405_v53, %v2995_v38  ;;  %v649_v29 = vadd.f32 %v3182_v13, %v607_v60 }
 0x155   :  { %v461_v24 = vmul.f32 0.25, %v393_v26  ;;  %2416 = vrsqrt.f32 %v497_v18  ;;  %2267 = vmatmul.mubr.msk.f32.gmra.mrb[10].mxu0 %vm94_vm0, %v648_v40  ;;  %v608_v25 = vmul.f32 %v3178_v57, %v566_v61 }
 0x156   :  { %v2407_v0 = vpop.eup %2406  ;;  %v498_v50 = vadd.f32 1e-05, %v460_v4  ;;  %v609_v45 = vmul.f32 %v3178_v57, %v567_v14  ;;  %2269 = vmatprep.mubr.msk.f32.mxu0 %vm94_vm0, %v649_v29 }
 0x157   :  { %v499_v59 = vadd.f32 1e-05, %v461_v24  ;;  %v2409_v55 = vpop.eup %2408  ;;  %v396_v33 = vpop.xlane.xlu1 %395  ;;  %v650_v47 = vadd.f32 %v3182_v13, %v608_v25  ;;  %v568_v38 = vmul.f32 %v2407_v0, %v2999_v39 }
 0x158   :  { %v399_v17 = vpop.xlane.xlu0 %398  ;;  %2418 = vrsqrt.f32 %v498_v50  ;;  %v462_v37 = vmul.f32 0.25, %v396_v33  ;;  %v651_v48 = vadd.f32 %v3182_v13, %v609_v45  ;;  %v569_v31 = vmul.f32 %v2409_v55, %v3009_v8 }
 0x159   :  { %v463_v5 = vmul.f32 0.25, %v399_v17  ;;  %2420 = vrsqrt.f32 %v499_v59  ;;  %2270 = vmatmul.mubr.msk.f32.gmra.mrb[12].mxu0 %vm94_vm0, %v650_v47  ;;  %v610_v34 = vmul.f32 %v3178_v57, %v568_v38 }
 0x15a   :  { %v2411_v20 = vpop.eup %2410  ;;  %v500_v56 = vadd.f32 1e-05, %v462_v37  ;;  %2272 = vmatprep.mubr.msk.f32.mxu0 %vm94_vm0, %v651_v48  ;;  %v611_v44 = vmul.f32 %v3178_v57, %v569_v31 }
 0x15b   :  { %v501_v42 = vadd.f32 1e-05, %v463_v5  ;;  %v2413_v23 = vpop.eup %2412  ;;  %v402_v43 = vpop.xlane.xlu1 %401  ;;  %v652_v6 = vadd.f32 %v3182_v13, %v610_v34  ;;  %v570_v51 = vmul.f32 %v2411_v20, %v3013_v3 }
 0x15c   :  { %v405_v39 = vpop.xlane.xlu0 %404  ;;  %2422 = vrsqrt.f32 %v500_v56  ;;  %v464_v9 = vmul.f32 0.25, %v402_v43  ;;  %v571_v22 = vmul.f32 %v2413_v23, %v3023_v16  ;;  %v653_v8 = vadd.f32 %v3182_v13, %v611_v44 }
 0x15d   :  { %v465_v11 = vmul.f32 0.25, %v405_v39  ;;  %2424 = vrsqrt.f32 %v501_v42  ;;  %2273 = vmatmul.mubr.msk.f32.gmra.mrb[14].mxu0 %vm94_vm0, %v652_v6  ;;  %v612_v18 = vmul.f32 %v3178_v57, %v570_v51 }
 0x15e   :  { %v2415_v53 = vpop.eup %2414  ;;  %v502_v12 = vadd.f32 1e-05, %v464_v9  ;;  %v613_v40 = vmul.f32 %v3178_v57, %v571_v22  ;;  %2275 = vmatprep.mubr.msk.f32.mxu0 %vm94_vm0, %v653_v8 }
 0x15f   :  { %v503_v26 = vadd.f32 1e-05, %v465_v11  ;;  %v2417_v60 = vpop.eup %2416  ;;  %v408_v3 = vpop.xlane.xlu1 %407  ;;  %v654_v4 = vadd.f32 %v3182_v13, %v612_v18  ;;  %v572_v16 = vmul.f32 %v2415_v53, %v3027_v2 }
 0x160   :  { %v411_v61 = vpop.xlane.xlu0 %410  ;;  %2426 = vrsqrt.f32 %v502_v12  ;;  %v466_v24 = vmul.f32 0.25, %v408_v3  ;;  %v655_v29 = vadd.f32 %v3182_v13, %v613_v40  ;;  %v573_v0 = vmul.f32 %v2417_v60, %v3037_v27 }
 0x161   :  { %v467_v14 = vmul.f32 0.25, %v411_v61  ;;  %2428 = vrsqrt.f32 %v503_v26  ;;  %2276 = vmatmul.mubr.msk.f32.gmra.mrb[16].mxu0 %vm94_vm0, %v654_v4  ;;  %v614_v25 = vmul.f32 %v3178_v57, %v572_v16 }
 0x162   :  { %v2419_v50 = vpop.eup %2418  ;;  %v504_v59 = vadd.f32 1e-05, %v466_v24  ;;  %2278 = vmatprep.mubr.msk.f32.mxu0 %vm94_vm0, %v655_v29  ;;  %v615_v47 = vmul.f32 %v3178_v57, %v573_v0 }
 0x163   :  { %v505_v45 = vadd.f32 1e-05, %v467_v14  ;;  %v2421_v55 = vpop.eup %2420  ;;  %v414_v33 = vpop.xlane.xlu1 %413  ;;  %v656_v17 = vadd.f32 %v3182_v13, %v614_v25  ;;  %v574_v38 = vmul.f32 %v2419_v50, %v3041_v1 }
 0x164   :  { %v417_v2 = vpop.xlane.xlu0 %416  ;;  %2430 = vrsqrt.f32 %v504_v59  ;;  %v468_v37 = vmul.f32 0.25, %v414_v33  ;;  %v575_v48 = vmul.f32 %v2421_v55, %v3054_v54  ;;  %v657_v27 = vadd.f32 %v3182_v13, %v615_v47 }
 0x165   :  { %v469_v5 = vmul.f32 0.25, %v417_v2  ;;  %2432 = vrsqrt.f32 %v505_v45  ;;  %2279 = vmatmul.mubr.msk.f32.gmra.mrb[18].mxu0 %vm94_vm0, %v656_v17  ;;  %v616_v34 = vmul.f32 %v3178_v57, %v574_v38 }
 0x166   :  { %v2423_v31 = vpop.eup %2422  ;;  %v506_v20 = vadd.f32 1e-05, %v468_v37  ;;  %v617_v42 = vmul.f32 %v3178_v57, %v575_v48  ;;  %2281 = vmatprep.mubr.msk.f32.mxu0 %vm94_vm0, %v657_v27 }
 0x167   :  { %v507_v56 = vadd.f32 1e-05, %v469_v5  ;;  %v2425_v23 = vpop.eup %2424  ;;  %v420_v1 = vpop.xlane.xlu1 %419  ;;  %v658_v39 = vadd.f32 %v3182_v13, %v616_v34  ;;  %v576_v54 = vmul.f32 %v2423_v31, %v3058_v46 }
 0x168   :  { %v423_v43 = vpop.xlane.xlu0 %422  ;;  %2434 = vrsqrt.f32 %v506_v20  ;;  %v470_v6 = vmul.f32 0.25, %v420_v1  ;;  %v659_v51 = vadd.f32 %v3182_v13, %v617_v42  ;;  %v577_v11 = vmul.f32 %v2425_v23, %v3070_v49 }
 0x169   :  { %v471_v44 = vmul.f32 0.25, %v423_v43  ;;  %2436 = vrsqrt.f32 %v507_v56  ;;  %2282 = vmatmul.mubr.msk.f32.gmra.mrb[20].mxu0 %vm94_vm0, %v658_v39  ;;  %v618_v9 = vmul.f32 %v3178_v57, %v576_v54 }
 0x16a   :  { %v2427_v22 = vpop.eup %2426  ;;  %v508_v8 = vadd.f32 1e-05, %v470_v6  ;;  %2284 = vmatprep.mubr.msk.f32.mxu0 %vm94_vm0, %v659_v51  ;;  %v619_v40 = vmul.f32 %v3178_v57, %v577_v11 }
 0x16b   :  { %v509_v18 = vadd.f32 1e-05, %v471_v44  ;;  %v2429_v53 = vpop.eup %2428  ;;  %v426_v12 = vpop.xlane.xlu1 %425  ;;  %v660_v26 = vadd.f32 %v3182_v13, %v618_v9  ;;  %v578_v60 = vmul.f32 %v2427_v22, %v3074_v52 }
 0x16c   :  { %v429_v46 = vpop.xlane.xlu0 %428  ;;  %2438 = vrsqrt.f32 %v508_v8  ;;  %v472_v3 = vmul.f32 0.25, %v426_v12  ;;  %v579_v4 = vmul.f32 %v2429_v53, %v3084_v32  ;;  %v661_v49 = vadd.f32 %v3182_v13, %v619_v40 }
 0x16d   :  { %v473_v61 = vmul.f32 0.25, %v429_v46  ;;  %2440 = vrsqrt.f32 %v509_v18  ;;  %2285 = vmatmul.mubr.msk.f32.gmra.mrb[22].mxu0 %vm94_vm0, %v660_v26  ;;  %v620_v16 = vmul.f32 %v3178_v57, %v578_v60 }
 0x16e   :  { %v2431_v24 = vpop.eup %2430  ;;  %v510_v14 = vadd.f32 1e-05, %v472_v3  ;;  %v621_v25 = vmul.f32 %v3178_v57, %v579_v4  ;;  %2287 = vmatprep.mubr.msk.f32.mxu0 %vm94_vm0, %v661_v49 }
 0x16f   :  { %v511_v29 = vadd.f32 1e-05, %v473_v61  ;;  %v2433_v0 = vpop.eup %2432  ;;  %v432_v52 = vpop.xlane.xlu1 %431  ;;  %v662_v59 = vadd.f32 %v3182_v13, %v620_v16  ;;  %v580_v32 = vmul.f32 %v2431_v24, %v3088_v58  ;;  %v678_v16 = vsub.s32 2, %v3168_v19 }
 0x170   :  { %v435_v50 = vpop.xlane.xlu0 %434  ;;  %2442 = vrsqrt.f32 %v510_v14  ;;  %v474_v45 = vmul.f32 0.25, %v432_v52  ;;  %v663_v33 = vadd.f32 %v3182_v13, %v621_v25  ;;  %v581_v17 = vmul.f32 %v2433_v0, %v3098_v7 }
 0x171   :  { %v475_v55 = vmul.f32 0.25, %v435_v50  ;;  %2444 = vrsqrt.f32 %v511_v29  ;;  %2288 = vmatmul.mubr.msk.f32.gmra.mrb[24].mxu0 %vm94_vm0, %v662_v59  ;;  %v622_v2 = vmul.f32 %v3178_v57, %v580_v32  ;;  %v3337_v24 = vrot.slane %v3174_v63, %v678_v16 }
 0x172   :  { %v2435_v47 = vpop.eup %2434  ;;  %v512_v38 = vadd.f32 1e-05, %v474_v45  ;;  %2290 = vmatprep.mubr.msk.f32.mxu0 %vm94_vm0, %v663_v33  ;;  %v623_v27 = vmul.f32 %v3178_v57, %v581_v17 }
 0x173   :  { %v513_v37 = vadd.f32 1e-05, %v475_v55  ;;  %v2437_v5 = vpop.eup %2436  ;;  %v438_v48 = vpop.xlane.xlu1 %437  ;;  %v664_v58 = vadd.f32 %v3182_v13, %v622_v2  ;;  %v582_v34 = vmul.f32 %v2435_v47, %v3102_v10 }
 0x174   :  { %2446 = vrsqrt.f32 %v512_v38  ;;  %v476_v31 = vmul.f32 0.25, %v438_v48  ;;  %v583_v20 = vmul.f32 %v2437_v5, %v3112_v15  ;;  %v665_v7 = vadd.f32 %v3182_v13, %v623_v27 }
 0x175   :  { %2448 = vrsqrt.f32 %v513_v37  ;;  %2291 = vmatmul.mubr.msk.f32.gmra.mrb[26].mxu0 %vm94_vm0, %v664_v58  ;;  %v624_v56 = vmul.f32 %v3178_v57, %v582_v34 }
 0x176   :  { %v2439_v42 = vpop.eup %2438  ;;  %v514_v23 = vadd.f32 1e-05, %v476_v31  ;;  %v625_v1 = vmul.f32 %v3178_v57, %v583_v20  ;;  %2293 = vmatprep.mubr.msk.f32.mxu0 %vm94_vm0, %v665_v7 }
 0x177   :  { %v2441_v43 = vpop.eup %2440  ;;  %v666_v10 = vadd.f32 %v3182_v13, %v624_v56  ;;  %v584_v39 = vmul.f32 %v2439_v42, %v3116_v28 }
 0x178   :  { %2450 = vrsqrt.f32 %v514_v23  ;;  %v667_v15 = vadd.f32 %v3182_v13, %v625_v1  ;;  %v585_v54 = vmul.f32 %v2441_v43, %v3126_v21 }
 0x179   :  { %2294 = vmatmul.mubr.msk.f32.gmra.mrb[28].mxu0 %vm94_vm0, %v666_v10  ;;  %v626_v6 = vmul.f32 %v3178_v57, %v584_v39 }
 0x17a   :  { %v2443_v44 = vpop.eup %2442  ;;  %2296 = vmatprep.mubr.msk.f32.mxu0 %vm94_vm0, %v667_v15  ;;  %v627_v51 = vmul.f32 %v3178_v57, %v585_v54 }
 0x17b   :  { %v2445_v9 = vpop.eup %2444  ;;  %v668_v11 = vadd.f32 %v3182_v13, %v626_v6  ;;  %v586_v22 = vmul.f32 %v2443_v44, %v3130_v35 }
 0x17c   :  { %v669_v28 = vadd.f32 %v3182_v13, %v627_v51  ;;  %v587_v8 = vmul.f32 %v2445_v9, %v3140_v36 }
 0x17d   :  { %2297 = vmatmul.mubr.msk.f32.gmra.mrb[30].mxu0 %vm94_vm0, %v668_v11  ;;  %v628_v21 = vmul.f32 %v3178_v57, %v586_v22 }
 0x17e   :  { %v2447_v18 = vpop.eup %2446  ;;  %2299 = vmatprep.mubr.msk.f32.mxu0 %vm94_vm0, %v669_v28  ;;  %v629_v53 = vmul.f32 %v3178_v57, %v587_v8 }
 0x17f   :  { %v2449_v12 = vpop.eup %2448  ;;  %v670_v46 = vadd.f32 %v3182_v13, %v628_v21  ;;  %v588_v26 = vmul.f32 %v2447_v18, %v3144_v41 }
 0x180   :  { %v671_v35 = vadd.f32 %v3182_v13, %v629_v53  ;;  %v589_v40 = vmul.f32 %v2449_v12, %v3154_v62 }
 0x181   :  { %2300 = vmatmul.mubr.msk.f32.gmra.mrb[32].mxu0 %vm94_vm0, %v670_v46  ;;  %v630_v36 = vmul.f32 %v3178_v57, %v588_v26 }
 0x182   :  { %v2451_v60 = vpop.eup %2450  ;;  %2302 = vmatprep.mubr.msk.f32.mxu0 %vm94_vm0, %v671_v35  ;;  %v631_v3 = vmul.f32 %v3178_v57, %v589_v40 }
 0x183   :  { %v672_v61 = vadd.f32 %v3182_v13, %v630_v36  ;;  %v590_v4 = vmul.f32 %v2451_v60, %v3158_v30 }
 0x184   :  { %v673_v49 = vadd.f32 %v3182_v13, %v631_v3 }
 0x185   :  { %2303 = vmatmul.mubr.msk.f32.gmra.mrb[34].mxu0 %vm94_vm0, %v672_v61  ;;  %v632_v41 = vmul.f32 %v3178_v57, %v590_v4 }
 0x186   :  { %2305 = vmatprep.mubr.msk.f32.mxu0 %vm94_vm0, %v673_v49 }
 0x187   :  { %v674_v62 = vadd.f32 %v3182_v13, %v632_v41 }
 0x189   :  { %2306 = vmatmul.mubr.msk.f32.gmra.mrb[36].mxu0 %vm94_vm0, %v674_v62 }
 0x214   :  { %v2253_v14 = vpop.f32.mrb[0].mxu0 }
 0x215   :  { %v3340_v30 = vadd.f32 %v2253_v14, %v3337_v24  ;;  %v864_v29 = vpop.f32.mrb[1].mxu0 }
 0x216   :  { %v3343_v25 = vadd.f32 %v864_v29, %v3337_v24 }
 0x217   :  { %v1054_v57 = vmax.f32 %v3340_v30, 0.0 }
 0x218   :  { %v1053_v13 = vmax.f32 %v3343_v25, 0.0  ;;  %v2256_v0 = vpop.f32.mrb[2].mxu0 }
 0x219   :  { %v3348_v52 = vadd.f32 %v2256_v0, %v3337_v24  ;;  %v874_v50 = vpop.f32.mrb[3].mxu0  ;;  %v1095_v63 = vsel %vm1091_vm3, %v1054_v57, 0.0 }
 0x21a   :  { %v3354_v59 = vadd.f32 %v874_v50, %v3337_v24  ;;  %1096 = vadd.xlane.f32.xlu1 %v1095_v63  ;;  %v1092_v32 = vsel %vm1091_vm3, %v1053_v13, 0.0 }
 0x21b   :  { %v1056_v45 = vmax.f32 %v3348_v52, 0.0  ;;  %1093 = vadd.xlane.f32.xlu0 %v1092_v32 }
 0x21c   :  { %v1055_v55 = vmax.f32 %v3354_v59, 0.0  ;;  %v2259_v33 = vpop.f32.mrb[4].mxu0 }
 0x21d   :  { %v3362_v2 = vadd.f32 %v2259_v33, %v3337_v24  ;;  %v884_v17 = vpop.f32.mrb[5].mxu0  ;;  %v1101_v47 = vsel %vm1091_vm3, %v1056_v45, 0.0 }
 0x21e   :  { %v3368_v38 = vadd.f32 %v884_v17, %v3337_v24  ;;  %1102 = vadd.xlane.f32.xlu1 %v1101_v47  ;;  %v1098_v37 = vsel %vm1091_vm3, %v1055_v55, 0.0 }
 0x21f   :  { %v1058_v5 = vmax.f32 %v3362_v2, 0.0  ;;  %1099 = vadd.xlane.f32.xlu0 %v1098_v37 }
 0x220   :  { %v1057_v48 = vmax.f32 %v3368_v38, 0.0  ;;  %v2262_v58 = vpop.f32.mrb[6].mxu0 }
 0x221   :  { %v3376_v27 = vadd.f32 %v2262_v58, %v3337_v24  ;;  %v894_v34 = vpop.f32.mrb[7].mxu0  ;;  %v1107_v31 = vsel %vm1091_vm3, %v1058_v5, 0.0 }
 0x222   :  { %v3382_v20 = vadd.f32 %v894_v34, %v3337_v24  ;;  %1108 = vadd.xlane.f32.xlu1 %v1107_v31  ;;  %v1104_v7 = vsel %vm1091_vm3, %v1057_v48, 0.0 }
 0x223   :  { %v1060_v56 = vmax.f32 %v3376_v27, 0.0  ;;  %1105 = vadd.xlane.f32.xlu0 %v1104_v7 }
 0x224   :  { %v1059_v42 = vmax.f32 %v3382_v20, 0.0  ;;  %v2265_v23 = vpop.f32.mrb[8].mxu0 }
 0x225   :  { %v3390_v1 = vadd.f32 %v2265_v23, %v3337_v24  ;;  %v904_v43 = vpop.f32.mrb[9].mxu0  ;;  %v1113_v10 = vsel %vm1091_vm3, %v1060_v56, 0.0 }
 0x226   :  { %v3396_v39 = vadd.f32 %v904_v43, %v3337_v24  ;;  %1114 = vadd.xlane.f32.xlu1 %v1113_v10  ;;  %v1110_v15 = vsel %vm1091_vm3, %v1059_v42, 0.0 }
 0x227   :  { %v1062_v54 = vmax.f32 %v3390_v1, 0.0  ;;  %1111 = vadd.xlane.f32.xlu0 %v1110_v15 }
 0x228   :  { %v1061_v6 = vmax.f32 %v3396_v39, 0.0  ;;  %v2268_v44 = vpop.f32.mrb[10].mxu0 }
 0x229   :  { %v3404_v51 = vadd.f32 %v2268_v44, %v3337_v24  ;;  %v914_v9 = vpop.f32.mrb[11].mxu0  ;;  %v1119_v11 = vsel %vm1091_vm3, %v1062_v54, 0.0 }
 0x22a   :  { %v3410_v22 = vadd.f32 %v914_v9, %v3337_v24  ;;  %1120 = vadd.xlane.f32.xlu1 %v1119_v11  ;;  %v1116_v28 = vsel %vm1091_vm3, %v1061_v6, 0.0 }
 0x22b   :  { %v1064_v8 = vmax.f32 %v3404_v51, 0.0  ;;  %1117 = vadd.xlane.f32.xlu0 %v1116_v28 }
 0x22c   :  { %v1063_v21 = vmax.f32 %v3410_v22, 0.0  ;;  %v2271_v18 = vpop.f32.mrb[12].mxu0 }
 0x22d   :  { %v3418_v53 = vadd.f32 %v2271_v18, %v3337_v24  ;;  %v924_v12 = vpop.f32.mrb[13].mxu0  ;;  %v1125_v46 = vsel %vm1091_vm3, %v1064_v8, 0.0 }
 0x22e   :  { %v3424_v26 = vadd.f32 %v924_v12, %v3337_v24  ;;  %1126 = vadd.xlane.f32.xlu1 %v1125_v46  ;;  %v1122_v35 = vsel %vm1091_vm3, %v1063_v21, 0.0 }
 0x22f   :  { %v1066_v40 = vmax.f32 %v3418_v53, 0.0  ;;  %1123 = vadd.xlane.f32.xlu0 %v1122_v35 }
 0x230   :  { %v4289_v36 = vmax.f32 %v3424_v26, 0.0  ;;  %v2274_v60 = vpop.f32.mrb[14].mxu0 }
 0x231   :  { %v3432_v3 = vadd.f32 %v2274_v60, %v3337_v24  ;;  %v934_v61 = vpop.f32.mrb[15].mxu0  ;;  %v1131_v4 = vsel %vm1091_vm3, %v1066_v40, 0.0 }
 0x232   :  { %v3438_v49 = vadd.f32 %v934_v61, %v3337_v24  ;;  %1132 = vadd.xlane.f32.xlu1 %v1131_v4  ;;  %v1128_v41 = vsel %vm1091_vm3, %v4289_v36, 0.0 }
 0x233   :  { %v4287_v62 = vmax.f32 %v3432_v3, 0.0  ;;  %1129 = vadd.xlane.f32.xlu0 %v1128_v41 }
 0x234   :  { %v4286_v16 = vmax.f32 %v3438_v49, 0.0  ;;  %v2277_v14 = vpop.f32.mrb[16].mxu0 }
 0x235   :  { %v3446_v29 = vadd.f32 %v2277_v14, %v3337_v24  ;;  %v944_v0 = vpop.f32.mrb[17].mxu0  ;;  %v1137_v50 = vsel %vm1091_vm3, %v4287_v62, 0.0 }
 0x236   :  { %v3452_v63 = vadd.f32 %v944_v0, %v3337_v24  ;;  %1138 = vadd.xlane.f32.xlu1 %v1137_v50  ;;  %v1134_v32 = vsel %vm1091_vm3, %v4286_v16, 0.0 }
 0x237   :  { %v4281_v33 = vmax.f32 %v3446_v29, 0.0  ;;  %1135 = vadd.xlane.f32.xlu0 %v1134_v32 }
 0x238   :  { %v4280_v17 = vmax.f32 %v3452_v63, 0.0  ;;  %v2280_v47 = vpop.f32.mrb[18].mxu0 }
 0x239   :  { %v3460_v37 = vadd.f32 %v2280_v47, %v3337_v24  ;;  %v954_v58 = vpop.f32.mrb[19].mxu0  ;;  %v1143_v34 = vsel %vm1091_vm3, %v4281_v33, 0.0 }
 0x23a   :  { %v3466_v31 = vadd.f32 %v954_v58, %v3337_v24  ;;  %1144 = vadd.xlane.f32.xlu1 %v1143_v34  ;;  %v1140_v7 = vsel %vm1091_vm3, %v4280_v17, 0.0 }
 0x23b   :  { %v4277_v23 = vmax.f32 %v3460_v37, 0.0  ;;  %1141 = vadd.xlane.f32.xlu0 %v1140_v7 }
 0x23c   :  { %v4276_v43 = vmax.f32 %v3466_v31, 0.0  ;;  %v2283_v10 = vpop.f32.mrb[20].mxu0 }
 0x23d   :  { %v3474_v15 = vadd.f32 %v2283_v10, %v3337_v24  ;;  %v964_v44 = vpop.f32.mrb[21].mxu0  ;;  %v1149_v9 = vsel %vm1091_vm3, %v4277_v23, 0.0 }
 0x23e   :  { %v3480_v11 = vadd.f32 %v964_v44, %v3337_v24  ;;  %1150 = vadd.xlane.f32.xlu1 %v1149_v9  ;;  %v1146_v28 = vsel %vm1091_vm3, %v4276_v43, 0.0 }
 0x23f   :  { %v4273_v18 = vmax.f32 %v3474_v15, 0.0  ;;  %1147 = vadd.xlane.f32.xlu0 %v1146_v28 }
 0x240   :  { %v4272_v12 = vmax.f32 %v3480_v11, 0.0  ;;  %v2286_v46 = vpop.f32.mrb[22].mxu0 }
 0x241   :  { %v3488_v35 = vadd.f32 %v2286_v46, %v3337_v24  ;;  %v974_v60 = vpop.f32.mrb[23].mxu0  ;;  %v1155_v61 = vsel %vm1091_vm3, %v4273_v18, 0.0 }
 0x242   :  { %v3494_v4 = vadd.f32 %v974_v60, %v3337_v24  ;;  %1156 = vadd.xlane.f32.xlu1 %v1155_v61  ;;  %v1152_v41 = vsel %vm1091_vm3, %v4272_v12, 0.0 }
 0x243   :  { %v4269_v14 = vmax.f32 %v3488_v35, 0.0  ;;  %1153 = vadd.xlane.f32.xlu0 %v1152_v41 }
 0x244   :  { %v4268_v0 = vmax.f32 %v3494_v4, 0.0  ;;  %v2289_v50 = vpop.f32.mrb[24].mxu0 }
 0x245   :  { %v3502_v32 = vadd.f32 %v2289_v50, %v3337_v24  ;;  %v984_v47 = vpop.f32.mrb[25].mxu0  ;;  %v1161_v58 = vsel %vm1091_vm3, %v4269_v14, 0.0 }
 0x246   :  { %v3508_v34 = vadd.f32 %v984_v47, %v3337_v24  ;;  %1162 = vadd.xlane.f32.xlu1 %v1161_v58  ;;  %v1158_v7 = vsel %vm1091_vm3, %v4268_v0, 0.0 }
 0x247   :  { %v4267_v10 = vmax.f32 %v3502_v32, 0.0  ;;  %1159 = vadd.xlane.f32.xlu0 %v1158_v7 }
 0x248   :  { %v4266_v44 = vmax.f32 %v3508_v34, 0.0  ;;  %v2292_v9 = vpop.f32.mrb[26].mxu0 }
 0x249   :  { %v3516_v28 = vadd.f32 %v2292_v9, %v3337_v24  ;;  %v994_v46 = vpop.f32.mrb[27].mxu0  ;;  %v1167_v60 = vsel %vm1091_vm3, %v4267_v10, 0.0 }
 0x24a   :  { %v3522_v61 = vadd.f32 %v994_v46, %v3337_v24  ;;  %1168 = vadd.xlane.f32.xlu1 %v1167_v60  ;;  %v1164_v41 = vsel %vm1091_vm3, %v4266_v44, 0.0 }
 0x24b   :  { %v4271_v50 = vmax.f32 %v3516_v28, 0.0  ;;  %1165 = vadd.xlane.f32.xlu0 %v1164_v41 }
 0x24c   :  { %v4270_v47 = vmax.f32 %v3522_v61, 0.0  ;;  %v2295_v58 = vpop.f32.mrb[28].mxu0 }
 0x24d   :  { %v3530_v7 = vadd.f32 %v2295_v58, %v3337_v24  ;;  %v1004_v9 = vpop.f32.mrb[29].mxu0  ;;  %v1173_v46 = vsel %vm1091_vm3, %v4271_v50, 0.0 }
 0x24e   :  { %v3536_v60 = vadd.f32 %v1004_v9, %v3337_v24  ;;  %1174 = vadd.xlane.f32.xlu1 %v1173_v46  ;;  %v1170_v44 = vsel %vm1091_vm3, %v4270_v47, 0.0 }
 0x24f   :  { %v4275_v41 = vmax.f32 %v3530_v7, 0.0  ;;  %1171 = vadd.xlane.f32.xlu0 %v1170_v44 }
 0x250   :  { %v4274_v10 = vmax.f32 %v3536_v60, 0.0  ;;  %v2298_v58 = vpop.f32.mrb[30].mxu0 }
 0x251   :  { %v3544_v0 = vadd.f32 %v2298_v58, %v3337_v24  ;;  %v1014_v14 = vpop.f32.mrb[31].mxu0  ;;  %v1179_v9 = vsel %vm1091_vm3, %v4275_v41, 0.0 }
 0x252   :  { %v3550_v46 = vadd.f32 %v1014_v14, %v3337_v24  ;;  %1180 = vadd.xlane.f32.xlu1 %v1179_v9  ;;  %v1176_v47 = vsel %vm1091_vm3, %v4274_v10, 0.0 }
 0x253   :  { %v4279_v44 = vmax.f32 %v3544_v0, 0.0  ;;  %1177 = vadd.xlane.f32.xlu0 %v1176_v47 }
 0x254   :  { %v4278_v50 = vmax.f32 %v3550_v46, 0.0  ;;  %v2301_v58 = vpop.f32.mrb[32].mxu0 }
 0x255   :  { %v3558_v12 = vadd.f32 %v2301_v58, %v3337_v24  ;;  %v1024_v18 = vpop.f32.mrb[33].mxu0  ;;  %v1185_v14 = vsel %vm1091_vm3, %v4279_v44, 0.0 }
 0x256   :  { %v3564_v9 = vadd.f32 %v1024_v18, %v3337_v24  ;;  %1186 = vadd.xlane.f32.xlu1 %v1185_v14  ;;  %v1182_v10 = vsel %vm1091_vm3, %v4278_v50, 0.0 }
 0x257   :  { %v4283_v47 = vmax.f32 %v3558_v12, 0.0  ;;  %1183 = vadd.xlane.f32.xlu0 %v1182_v10 }
 0x258   :  { %v4282_v41 = vmax.f32 %v3564_v9, 0.0  ;;  %v2304_v58 = vpop.f32.mrb[34].mxu0 }
 0x259   :  { %v3572_v43 = vadd.f32 %v2304_v58, %v3337_v24  ;;  %v1034_v23 = vpop.f32.mrb[35].mxu0  ;;  %v1191_v18 = vsel %vm1091_vm3, %v4283_v47, 0.0 }
 0x25a   :  { %v3578_v14 = vadd.f32 %v1034_v23, %v3337_v24  ;;  %1192 = vadd.xlane.f32.xlu1 %v1191_v18  ;;  %v1188_v50 = vsel %vm1091_vm3, %v4282_v41, 0.0 }
 0x25b   :  { %v4284_v10 = vmax.f32 %v3572_v43, 0.0  ;;  %1189 = vadd.xlane.f32.xlu0 %v1188_v50 }
 0x25c   :  { %v4285_v44 = vmax.f32 %v3578_v14, 0.0  ;;  %v2307_v58 = vpop.f32.mrb[36].mxu0 }
 0x25d   :  { %v3586_v17 = vadd.f32 %v2307_v58, %v3337_v24  ;;  %v1044_v33 = vpop.f32.mrb[37].mxu0  ;;  %v1197_v23 = vsel %vm1091_vm3, %v4284_v10, 0.0 }
 0x25e   :  { %v3592_v18 = vadd.f32 %v1044_v33, %v3337_v24  ;;  %1198 = vadd.xlane.f32.xlu1 %v1197_v23  ;;  %v1194_v41 = vsel %vm1091_vm3, %v4285_v44, 0.0 }
 0x25f   :  { %v4288_v50 = vmax.f32 %v3586_v17, 0.0  ;;  %1195 = vadd.xlane.f32.xlu0 %v1194_v41 }
 0x260   :  { %v4290_v58 = vmax.f32 %v3592_v18, 0.0 }
 0x261   :  { %v1204_v47 = vsel %vm1203_vm4, %v4288_v50, 0.0 }
 0x262   :  { %1205 = vadd.xlane.f32.xlu1 %v1204_v47  ;;  %v1200_v24 = vsel %vm1091_vm3, %v4290_v58, 0.0 }
 0x263   :  { %1201 = vadd.xlane.f32.xlu0 %v1200_v24 }
 0x2a7   :  { %v1097_v33 = vpop.xlane.xlu1 %1096 }
 0x2a8   :  { %v1209_v23 = vmul.f32 0.083333336, %v1097_v33  ;;  %v1094_v10 = vpop.xlane.xlu0 %1093 }
 0x2a9   :  { %v1208_v44 = vmul.f32 0.083333336, %v1094_v10 }
 0x2aa   :  { %v3607_v16 = vsub.f32 %v1054_v57, %v1209_v23 }
 0x2ab   :  { %v3611_v41 = vsub.f32 %v1053_v13, %v1208_v44  ;;  %v1103_v62 = vpop.xlane.xlu1 %1102 }
 0x2ac   :  { %v1211_v50 = vmul.f32 0.083333336, %v1103_v62  ;;  %v1100_v47 = vpop.xlane.xlu0 %1099  ;;  %v1285_v36 = vmul.f32 %v3607_v16, %v3607_v16 }
 0x2ad   :  { %v1210_v58 = vmul.f32 0.083333336, %v1100_v47  ;;  %v1284_v24 = vmul.f32 %v3611_v41, %v3611_v41 }
 0x2ae   :  { %v3619_v10 = vsub.f32 %v1056_v45, %v1211_v50  ;;  %v1325_v30 = vsel %vm1091_vm3, %v1285_v36, 0.0 }
 0x2af   :  { %v3624_v25 = vsub.f32 %v1055_v55, %v1210_v58  ;;  %v1109_v57 = vpop.xlane.xlu1 %1108  ;;  %1326 = vadd.xlane.f32.xlu1 %v1325_v30  ;;  %v1322_v13 = vsel %vm1091_vm3, %v1284_v24, 0.0 }
 0x2b0   :  { %v1213_v62 = vmul.f32 0.083333336, %v1109_v57  ;;  %1323 = vadd.xlane.f32.xlu0 %v1322_v13  ;;  %v1106_v44 = vpop.xlane.xlu0 %1105  ;;  %v1287_v33 = vmul.f32 %v3619_v10, %v3619_v10 }
 0x2b1   :  { %v1212_v23 = vmul.f32 0.083333336, %v1106_v44  ;;  %v1286_v52 = vmul.f32 %v3624_v25, %v3624_v25 }
 0x2b2   :  { %v3633_v45 = vsub.f32 %v1058_v5, %v1213_v62  ;;  %v1331_v59 = vsel %vm1091_vm3, %v1287_v33, 0.0 }
 0x2b3   :  { %v3638_v55 = vsub.f32 %v1057_v48, %v1212_v23  ;;  %v1115_v36 = vpop.xlane.xlu1 %1114  ;;  %1332 = vadd.xlane.f32.xlu1 %v1331_v59  ;;  %v1328_v50 = vsel %vm1091_vm3, %v1286_v52, 0.0 }
 0x2b4   :  { %v1215_v58 = vmul.f32 0.083333336, %v1115_v36  ;;  %1329 = vadd.xlane.f32.xlu0 %v1328_v50  ;;  %v1112_v47 = vpop.xlane.xlu0 %1111  ;;  %v1289_v24 = vmul.f32 %v3633_v45, %v3633_v45 }
 0x2b5   :  { %v1214_v30 = vmul.f32 0.083333336, %v1112_v47  ;;  %v1288_v2 = vmul.f32 %v3638_v55, %v3638_v55 }
 0x2b6   :  { %v3647_v5 = vsub.f32 %v1060_v56, %v1215_v58  ;;  %v1337_v38 = vsel %vm1091_vm3, %v1289_v24, 0.0 }
 0x2b7   :  { %v3652_v48 = vsub.f32 %v1059_v42, %v1214_v30  ;;  %v1121_v57 = vpop.xlane.xlu1 %1120  ;;  %1338 = vadd.xlane.f32.xlu1 %v1337_v38  ;;  %v1334_v13 = vsel %vm1091_vm3, %v1288_v2, 0.0 }
 0x2b8   :  { %v1217_v62 = vmul.f32 0.083333336, %v1121_v57  ;;  %1335 = vadd.xlane.f32.xlu0 %v1334_v13  ;;  %v1118_v44 = vpop.xlane.xlu0 %1117  ;;  %v1291_v33 = vmul.f32 %v3647_v5, %v3647_v5 }
 0x2b9   :  { %v1216_v23 = vmul.f32 0.083333336, %v1118_v44  ;;  %v1290_v27 = vmul.f32 %v3652_v48, %v3652_v48 }
 0x2ba   :  { %v3661_v56 = vsub.f32 %v1062_v54, %v1217_v62  ;;  %v1343_v20 = vsel %vm1091_vm3, %v1291_v33, 0.0 }
 0x2bb   :  { %v3666_v42 = vsub.f32 %v1061_v6, %v1216_v23  ;;  %v1127_v52 = vpop.xlane.xlu1 %1126  ;;  %1344 = vadd.xlane.f32.xlu1 %v1343_v20  ;;  %v1340_v59 = vsel %vm1091_vm3, %v1290_v27, 0.0 }
 0x2bc   :  { %v1219_v36 = vmul.f32 0.083333336, %v1127_v52  ;;  %1341 = vadd.xlane.f32.xlu0 %v1340_v59  ;;  %v1124_v50 = vpop.xlane.xlu0 %1123  ;;  %v1293_v58 = vmul.f32 %v3661_v56, %v3661_v56 }
 0x2bd   :  { %v1218_v47 = vmul.f32 0.083333336, %v1124_v50  ;;  %v1292_v1 = vmul.f32 %v3666_v42, %v3666_v42 }
 0x2be   :  { %v3675_v54 = vsub.f32 %v1064_v8, %v1219_v36  ;;  %v1349_v39 = vsel %vm1091_vm3, %v1293_v58, 0.0  ;;  %v4317_v36 = vmax.f32 %v3438_v49, 0.0 }
 0x2bf   :  { %v3680_v6 = vsub.f32 %v1063_v21, %v1218_v47  ;;  %v1133_v24 = vpop.xlane.xlu1 %1132  ;;  %1350 = vadd.xlane.f32.xlu1 %v1349_v39  ;;  %v1346_v30 = vsel %vm1091_vm3, %v1292_v1, 0.0  ;;  %v4315_v21 = vmax.f32 %v3424_v26, 0.0 }
 0x2c0   :  { %v1221_v2 = vmul.f32 0.083333336, %v1133_v24  ;;  %1347 = vadd.xlane.f32.xlu0 %v1346_v30  ;;  %v1130_v38 = vpop.xlane.xlu0 %1129  ;;  %v1295_v57 = vmul.f32 %v3675_v54, %v3675_v54 }
 0x2c1   :  { %v1220_v13 = vmul.f32 0.083333336, %v1130_v38  ;;  %v1294_v51 = vmul.f32 %v3680_v6, %v3680_v6 }
 0x2c2   :  { %v3689_v8 = vsub.f32 %v1066_v40, %v1221_v2  ;;  %v1355_v22 = vsel %vm1091_vm3, %v1295_v57, 0.0  ;;  %v4316_v40 = vmax.f32 %v3432_v3, 0.0  ;;  %v4318_v2 = vmax.f32 %v3446_v29, 0.0 }
 0x2c3   :  { %v3694_v62 = vsub.f32 %v4315_v21, %v1220_v13  ;;  %v1139_v44 = vpop.xlane.xlu1 %1138  ;;  %1356 = vadd.xlane.f32.xlu1 %v1355_v22  ;;  %v1352_v33 = vsel %vm1091_vm3, %v1294_v51, 0.0  ;;  %v4319_v57 = vmax.f32 %v3452_v63, 0.0 }
 0x2c4   :  { %v1223_v23 = vmul.f32 0.083333336, %v1139_v44  ;;  %1353 = vadd.xlane.f32.xlu0 %v1352_v33  ;;  %v1136_v27 = vpop.xlane.xlu0 %1135  ;;  %v1297_v20 = vmul.f32 %v3689_v8, %v3689_v8 }
 0x2c5   :  { %v1222_v52 = vmul.f32 0.083333336, %v1136_v27  ;;  %v1296_v53 = vmul.f32 %v3694_v62, %v3694_v62  ;;  %v4320_v27 = vmax.f32 %v3460_v37, 0.0  ;;  %v1673_v37 = vld [vmem:[%s4240_s3 + $0x8] sm:$0xf] }
 0x2c6   :  { %v3703_v59 = vsub.f32 %v4316_v40, %v1223_v23  ;;  %v1361_v26 = vsel %vm1091_vm3, %v1297_v20, 0.0 }
 0x2c7   :  { %v3708_v50 = vsub.f32 %v4317_v36, %v1222_v52  ;;  %v1145_v58 = vpop.xlane.xlu1 %1144  ;;  %1362 = vadd.xlane.f32.xlu1 %v1361_v26  ;;  %v1358_v47 = vsel %vm1091_vm3, %v1296_v53, 0.0  ;;  %v4321_v52 = vmax.f32 %v3466_v31, 0.0  ;;  %v1672_v36 = vld [vmem:[%s4240_s3] sm:$0xff] }
 0x2c8   :  { %v1225_v1 = vmul.f32 0.083333336, %v1145_v58  ;;  %1359 = vadd.xlane.f32.xlu0 %v1358_v47  ;;  %v1142_v39 = vpop.xlane.xlu0 %1141  ;;  %v1299_v24 = vmul.f32 %v3703_v59, %v3703_v59 }
 0x2c9   :  { %v1224_v30 = vmul.f32 0.083333336, %v1142_v39  ;;  %v1298_v3 = vmul.f32 %v3708_v50, %v3708_v50 }
 0x2ca   :  { %v3717_v38 = vsub.f32 %v4318_v2, %v1225_v1  ;;  %v1367_v49 = vsel %vm1091_vm3, %v1299_v24, 0.0  ;;  %v2369_v1 = vpack.c.bf16 %v1673_v37, %v1672_v36 }
 0x2cb   :  { %v3722_v13 = vsub.f32 %v4319_v57, %v1224_v30  ;;  %v1151_v51 = vpop.xlane.xlu1 %1150  ;;  %1368 = vadd.xlane.f32.xlu1 %v1367_v49  ;;  %v1364_v22 = vsel %vm1091_vm3, %v1298_v3, 0.0  ;;  %v4322_v30 = vmax.f32 %v3474_v15, 0.0  ;;  %v4323_v49 = vmax.f32 %v3480_v11, 0.0 }
 0x2cc   :  { %v1227_v21 = vmul.f32 0.083333336, %v1151_v51  ;;  %1365 = vadd.xlane.f32.xlu0 %v1364_v22  ;;  %v1148_v44 = vpop.xlane.xlu0 %1147  ;;  %v1301_v33 = vmul.f32 %v3717_v38, %v3717_v38  ;;  %2371 = vmatprep.subr.msk.bf16.mxu1 %vm2370_vm6, %v2369_v1 }
 0x2cd   :  { %v1226_v23 = vmul.f32 0.083333336, %v1148_v44  ;;  %v1300_v29 = vmul.f32 %v3722_v13, %v3722_v13  ;;  %2374 = vmatpush3.bf16.msk.msra.mxu1 %vm2370_vm6, %v2369_v1 }
 0x2ce   :  { %v3731_v20 = vsub.f32 %v4320_v27, %v1227_v21  ;;  %v1373_v63 = vsel %vm1091_vm3, %v1301_v33, 0.0 }
 0x2cf   :  { %v3736_v53 = vsub.f32 %v4321_v52, %v1226_v23  ;;  %v1157_v40 = vpop.xlane.xlu1 %1156  ;;  %1374 = vadd.xlane.f32.xlu1 %v1373_v63  ;;  %v1370_v26 = vsel %vm1091_vm3, %v1300_v29, 0.0  ;;  %v4324_v29 = vmax.f32 %v3488_v35, 0.0  ;;  %v4325_v63 = vmax.f32 %v3494_v4, 0.0 }
 0x2d0   :  { %v1229_v58 = vmul.f32 0.083333336, %v1157_v40  ;;  %1371 = vadd.xlane.f32.xlu0 %v1370_v26  ;;  %v1154_v47 = vpop.xlane.xlu0 %1153  ;;  %v1303_v31 = vmul.f32 %v3731_v20, %v3731_v20 }
 0x2d1   :  { %v1228_v39 = vmul.f32 0.083333336, %v1154_v47  ;;  %v1302_v24 = vmul.f32 %v3736_v53, %v3736_v53 }
 0x2d2   :  { %v3752_v3 = vsub.f32 %v4322_v30, %v1229_v58  ;;  %v1379_v2 = vsel %vm1091_vm3, %v1303_v31, 0.0  ;;  %v4326_v31 = vmax.f32 %v3502_v32, 0.0 }
 0x2d3   :  { %v3757_v57 = vsub.f32 %v4323_v49, %v1228_v39  ;;  %v1163_v51 = vpop.xlane.xlu1 %1162  ;;  %1380 = vadd.xlane.f32.xlu1 %v1379_v2  ;;  %v1376_v22 = vsel %vm1091_vm3, %v1302_v24, 0.0  ;;  %v4327_v39 = vmax.f32 %v3508_v34, 0.0 }
 0x2d4   :  { %v1231_v21 = vmul.f32 0.083333336, %v1163_v51  ;;  %1377 = vadd.xlane.f32.xlu0 %v1376_v22  ;;  %v1160_v44 = vpop.xlane.xlu0 %1159  ;;  %v1305_v15 = vmul.f32 %v3752_v3, %v3752_v3 }
 0x2d5   :  { %v1230_v33 = vmul.f32 0.083333336, %v1160_v44  ;;  %v1304_v23 = vmul.f32 %v3757_v57, %v3757_v57  ;;  %v4328_v44 = vmax.f32 %v3516_v28, 0.0 }
 0x2d6   :  { %v3766_v11 = vsub.f32 %v4324_v29, %v1231_v21  ;;  %v1385_v27 = vsel %vm1091_vm3, %v1305_v15, 0.0 }
 0x2d7   :  { %v3771_v52 = vsub.f32 %v4325_v63, %v1230_v33  ;;  %v1169_v40 = vpop.xlane.xlu1 %1168  ;;  %1386 = vadd.xlane.f32.xlu1 %v1385_v27  ;;  %v1382_v26 = vsel %vm1091_vm3, %v1304_v23, 0.0  ;;  %v4329_v33 = vmax.f32 %v3522_v61, 0.0 }
 0x2d8   :  { %v1233_v36 = vmul.f32 0.083333336, %v1169_v40  ;;  %1383 = vadd.xlane.f32.xlu0 %v1382_v26  ;;  %v1166_v37 = vpop.xlane.xlu0 %1165  ;;  %v1307_v58 = vmul.f32 %v3766_v11, %v3766_v11 }
 0x2d9   :  { %v1232_v47 = vmul.f32 0.083333336, %v1166_v37  ;;  %v1306_v35 = vmul.f32 %v3771_v52, %v3771_v52  ;;  %v4330_v37 = vmax.f32 %v3530_v7, 0.0 }
 0x2da   :  { %v3780_v1 = vsub.f32 %v4326_v31, %v1233_v36  ;;  %v1391_v4 = vsel %vm1091_vm3, %v1307_v58, 0.0 }
 0x2db   :  { %v3785_v24 = vsub.f32 %v4327_v39, %v1232_v47  ;;  %v1175_v30 = vpop.xlane.xlu1 %1174  ;;  %1392 = vadd.xlane.f32.xlu1 %v1391_v4  ;;  %v1388_v2 = vsel %vm1091_vm3, %v1306_v35, 0.0  ;;  %v4331_v47 = vmax.f32 %v3536_v60, 0.0 }
 0x2dc   :  { %v1235_v49 = vmul.f32 0.083333336, %v1175_v30  ;;  %1389 = vadd.xlane.f32.xlu0 %v1388_v2  ;;  %v1172_v51 = vpop.xlane.xlu0 %1171  ;;  %v1309_v22 = vmul.f32 %v3780_v1, %v3780_v1 }
 0x2dd   :  { %v1234_v21 = vmul.f32 0.083333336, %v1172_v51  ;;  %v1308_v32 = vmul.f32 %v3785_v24, %v3785_v24  ;;  %v4332_v51 = vmax.f32 %v3544_v0, 0.0 }
 0x2de   :  { %v3794_v15 = vsub.f32 %v4328_v44, %v1235_v49  ;;  %v1397_v34 = vsel %vm1091_vm3, %v1309_v22, 0.0 }
 0x2df   :  { %v3799_v23 = vsub.f32 %v4329_v33, %v1234_v21  ;;  %v1181_v29 = vpop.xlane.xlu1 %1180  ;;  %1398 = vadd.xlane.f32.xlu1 %v1397_v34  ;;  %v1394_v27 = vsel %vm1091_vm3, %v1308_v32, 0.0  ;;  %v4333_v21 = vmax.f32 %v3550_v46, 0.0 }
 0x2e0   :  { %v1237_v63 = vmul.f32 0.083333336, %v1181_v29  ;;  %1395 = vadd.xlane.f32.xlu0 %v1394_v27  ;;  %v1178_v40 = vpop.xlane.xlu0 %1177  ;;  %v1311_v26 = vmul.f32 %v3794_v15, %v3794_v15 }
 0x2e1   :  { %v1236_v36 = vmul.f32 0.083333336, %v1178_v40  ;;  %v1310_v28 = vmul.f32 %v3799_v23, %v3799_v23  ;;  %v4334_v40 = vmax.f32 %v3558_v12, 0.0 }
 0x2e2   :  { %v3808_v58 = vsub.f32 %v4330_v37, %v1237_v63  ;;  %v1403_v61 = vsel %vm1091_vm3, %v1311_v26, 0.0 }
 0x2e3   :  { %v3813_v35 = vsub.f32 %v4331_v47, %v1236_v36  ;;  %v1187_v31 = vpop.xlane.xlu1 %1186  ;;  %1404 = vadd.xlane.f32.xlu1 %v1403_v61  ;;  %v1400_v4 = vsel %vm1091_vm3, %v1310_v28, 0.0  ;;  %v4335_v36 = vmax.f32 %v3564_v9, 0.0 }
 0x2e4   :  { %v1239_v39 = vmul.f32 0.083333336, %v1187_v31  ;;  %1401 = vadd.xlane.f32.xlu0 %v1400_v4  ;;  %v1184_v30 = vpop.xlane.xlu0 %1183  ;;  %v1313_v2 = vmul.f32 %v3808_v58, %v3808_v58 }
 0x2e5   :  { %v1238_v49 = vmul.f32 0.083333336, %v1184_v30  ;;  %v1312_v7 = vmul.f32 %v3813_v35, %v3813_v35  ;;  %v4336_v30 = vmax.f32 %v3572_v43, 0.0 }
 0x2e6   :  { %v3822_v22 = vsub.f32 %v4332_v51, %v1239_v39  ;;  %v1409_v60 = vsel %vm1091_vm3, %v1313_v2, 0.0 }
 0x2e7   :  { %v3827_v32 = vsub.f32 %v4333_v21, %v1238_v49  ;;  %v1193_v44 = vpop.xlane.xlu1 %1192  ;;  %1410 = vadd.xlane.f32.xlu1 %v1409_v60  ;;  %v1406_v34 = vsel %vm1091_vm3, %v1312_v7, 0.0  ;;  %v4337_v49 = vmax.f32 %v3578_v14, 0.0 }
 0x2e8   :  { %v1241_v33 = vmul.f32 0.083333336, %v1193_v44  ;;  %1407 = vadd.xlane.f32.xlu0 %v1406_v34  ;;  %v1190_v29 = vpop.xlane.xlu0 %1189  ;;  %v1315_v27 = vmul.f32 %v3822_v22, %v3822_v22 }
 0x2e9   :  { %v1240_v63 = vmul.f32 0.083333336, %v1190_v29  ;;  %v1314_v0 = vmul.f32 %v3827_v32, %v3827_v32  ;;  %v4338_v29 = vmax.f32 %v3586_v17, 0.0 }
 0x2ea   :  { %v3836_v26 = vsub.f32 %v4334_v40, %v1241_v33  ;;  %v1415_v46 = vsel %vm1091_vm3, %v1315_v27, 0.0 }
 0x2eb   :  { %v3841_v28 = vsub.f32 %v4335_v36, %v1240_v63  ;;  %v1199_v37 = vpop.xlane.xlu1 %1198  ;;  %1416 = vadd.xlane.f32.xlu1 %v1415_v46  ;;  %v1412_v61 = vsel %vm1091_vm3, %v1314_v0, 0.0  ;;  %v4339_v63 = vmax.f32 %v3592_v18, 0.0 }
 0x2ec   :  { %v1243_v47 = vmul.f32 0.083333336, %v1199_v37  ;;  %1413 = vadd.xlane.f32.xlu0 %v1412_v61  ;;  %v1196_v31 = vpop.xlane.xlu0 %1195  ;;  %v1317_v4 = vmul.f32 %v3836_v26, %v3836_v26 }
 0x2ed   :  { %v1242_v39 = vmul.f32 0.083333336, %v1196_v31  ;;  %v1316_v12 = vmul.f32 %v3841_v28, %v3841_v28 }
 0x2ee   :  { %v3850_v2 = vsub.f32 %v4336_v30, %v1243_v47  ;;  %v1421_v9 = vsel %vm1091_vm3, %v1317_v4, 0.0 }
 0x2ef   :  { %v3855_v7 = vsub.f32 %v4337_v49, %v1242_v39  ;;  %1422 = vadd.xlane.f32.xlu1 %v1421_v9  ;;  %v1206_v51 = vpop.xlane.xlu1 %1205  ;;  %v1418_v60 = vsel %vm1091_vm3, %v1316_v12, 0.0 }
 0x2f0   :  { %v1245_v21 = vmul.f32 0.083333336, %v1206_v51  ;;  %1419 = vadd.xlane.f32.xlu0 %v1418_v60  ;;  %v1202_v44 = vpop.xlane.xlu0 %1201  ;;  %v1319_v34 = vmul.f32 %v3850_v2, %v3850_v2 }
 0x2f1   :  { %v1244_v33 = vmul.f32 0.083333336, %v1202_v44  ;;  %v1318_v43 = vmul.f32 %v3855_v7, %v3855_v7 }
 0x2f2   :  { %v3864_v27 = vsub.f32 %v4338_v29, %v1245_v21  ;;  %v1427_v14 = vsel %vm1091_vm3, %v1319_v34, 0.0 }
 0x2f3   :  { %v3869_v0 = vsub.f32 %v4339_v63, %v1244_v33  ;;  %1428 = vadd.xlane.f32.xlu1 %v1427_v14  ;;  %v1424_v40 = vsel %vm1091_vm3, %v1318_v43, 0.0  ;;  %v1590_v43 = vsub.s32 3, %v3168_v19 }
 0x2f4   :  { %1425 = vadd.xlane.f32.xlu0 %v1424_v40  ;;  %v1321_v46 = vmul.f32 %v3864_v27, %v3864_v27 }
 0x2f5   :  { %v1320_v36 = vmul.f32 %v3869_v0, %v3869_v0 }
 0x2f6   :  { %v1433_v17 = vsel %vm1203_vm4, %v1321_v46, 0.0 }
 0x2f7   :  { %1434 = vadd.xlane.f32.xlu1 %v1433_v17  ;;  %v1430_v37 = vsel %vm1091_vm3, %v1320_v36, 0.0  ;;  %v1632_v36 = vsub.s32 4, %v3168_v19 }
 0x2f8   :  { %1431 = vadd.xlane.f32.xlu0 %v1430_v37  ;;  %v3883_v37 = vld [vmem:[%s4239_s1] sm:$0xff] }
 0x33c   :  { %v1327_v61 = vpop.xlane.xlu1 %1326 }
 0x33d   :  { %v1437_v18 = vmul.f32 0.083333336, %v1327_v61  ;;  %v1324_v47 = vpop.xlane.xlu0 %1323  ;;  %v3886_v61 = vrot.slane %v3883_v37, %v1590_v43 }
 0x33e   :  { %v1436_v31 = vmul.f32 0.083333336, %v1324_v47 }
 0x33f   :  { %v1475_v4 = vadd.f32 1e-05, %v1437_v18 }
 0x340   :  { %v1474_v39 = vadd.f32 1e-05, %v1436_v31  ;;  %v1333_v12 = vpop.xlane.xlu1 %1332 }
 0x341   :  { %2452 = vrsqrt.f32 %v1475_v4  ;;  %v1439_v30 = vmul.f32 0.083333336, %v1333_v12  ;;  %v1330_v9 = vpop.xlane.xlu0 %1329 }
 0x342   :  { %2454 = vrsqrt.f32 %v1474_v39  ;;  %v1438_v49 = vmul.f32 0.083333336, %v1330_v9 }
 0x343   :  { %v1477_v51 = vadd.f32 1e-05, %v1439_v30 }
 0x344   :  { %v1476_v60 = vadd.f32 1e-05, %v1438_v49  ;;  %v1339_v21 = vpop.xlane.xlu1 %1338 }
 0x345   :  { %2456 = vrsqrt.f32 %v1477_v51  ;;  %v1441_v44 = vmul.f32 0.083333336, %v1339_v21  ;;  %v1336_v34 = vpop.xlane.xlu0 %1335  ;;  %v3891_v51 = vrot.slane %v3883_v37, %v1632_v36 }
 0x346   :  { %2458 = vrsqrt.f32 %v1476_v60  ;;  %v1440_v33 = vmul.f32 0.083333336, %v1336_v34 }
 0x347   :  { %v1479_v29 = vadd.f32 1e-05, %v1441_v44 }
 0x348   :  { %v1478_v14 = vadd.f32 1e-05, %v1440_v33  ;;  %v1345_v63 = vpop.xlane.xlu1 %1344 }
 0x349   :  { %2460 = vrsqrt.f32 %v1479_v29  ;;  %v1443_v40 = vmul.f32 0.083333336, %v1345_v63  ;;  %v1342_v46 = vpop.xlane.xlu0 %1341 }
 0x34a   :  { %2462 = vrsqrt.f32 %v1478_v14  ;;  %v1442_v17 = vmul.f32 0.083333336, %v1342_v46 }
 0x34b   :  { %v2453_v18 = vpop.eup %2452  ;;  %v1481_v47 = vadd.f32 1e-05, %v1443_v40 }
 0x34c   :  { %v2455_v31 = vpop.eup %2454  ;;  %v1480_v4 = vadd.f32 1e-05, %v1442_v17  ;;  %v1351_v39 = vpop.xlane.xlu1 %1350  ;;  %v1551_v12 = vmul.f32 %v2453_v18, %v3607_v16 }
 0x34d   :  { %2464 = vrsqrt.f32 %v1481_v47  ;;  %v1445_v30 = vmul.f32 0.083333336, %v1351_v39  ;;  %v1348_v9 = vpop.xlane.xlu0 %1347  ;;  %v1550_v49 = vmul.f32 %v2455_v31, %v3611_v41 }
 0x34e   :  { %2466 = vrsqrt.f32 %v1480_v4  ;;  %v1444_v60 = vmul.f32 0.083333336, %v1348_v9  ;;  %v1593_v21 = vmul.f32 %v3886_v61, %v1551_v12 }
 0x34f   :  { %v2457_v44 = vpop.eup %2456  ;;  %v1483_v34 = vadd.f32 1e-05, %v1445_v30  ;;  %v1592_v33 = vmul.f32 %v3886_v61, %v1550_v49 }
 0x350   :  { %v2459_v43 = vpop.eup %2458  ;;  %v1482_v29 = vadd.f32 1e-05, %v1444_v60  ;;  %v1357_v14 = vpop.xlane.xlu1 %1356  ;;  %v1553_v16 = vmul.f32 %v2457_v44, %v3619_v10  ;;  %v1635_v17 = vadd.f32 %v3891_v51, %v1593_v21 }
 0x351   :  { %2468 = vrsqrt.f32 %v1483_v34  ;;  %v1447_v63 = vmul.f32 0.083333336, %v1357_v14  ;;  %v1354_v40 = vpop.xlane.xlu0 %1353  ;;  %v1634_v41 = vadd.f32 %v3891_v51, %v1592_v33  ;;  %v1552_v46 = vmul.f32 %v2459_v43, %v3624_v25 }
 0x352   :  { %2470 = vrsqrt.f32 %v1482_v29  ;;  %v1446_v36 = vmul.f32 0.083333336, %v1354_v40  ;;  %v1595_v18 = vmul.f32 %v3886_v61, %v1553_v16 }
 0x353   :  { %v2461_v47 = vpop.eup %2460  ;;  %v1485_v31 = vadd.f32 1e-05, %v1447_v63  ;;  %2312 = vmatprep.mubr.msk.f32.mxu1 %vm1091_vm3, %v1634_v41  ;;  %v1594_v4 = vmul.f32 %v3886_v61, %v1552_v46 }
 0x354   :  { %v2463_v10 = vpop.eup %2462  ;;  %v1484_v39 = vadd.f32 1e-05, %v1446_v36  ;;  %v1363_v12 = vpop.xlane.xlu1 %1362  ;;  %2313 = vmatmul.mubr.msk.f32.vlgmr.msra.gmra.mrb[0].mxu1 %vm1091_vm3, %v1635_v17  ;;  %v1555_v30 = vmul.f32 %v2461_v47, %v3633_v45  ;;  %v1637_v44 = vadd.f32 %v3891_v51, %v1595_v18 }
 0x355   :  { %2472 = vrsqrt.f32 %v1485_v31  ;;  %v1449_v25 = vmul.f32 0.083333336, %v1363_v12  ;;  %v1360_v9 = vpop.xlane.xlu0 %1359  ;;  %v1636_v49 = vadd.f32 %v3891_v51, %v1594_v4  ;;  %v1554_v60 = vmul.f32 %v2463_v10, %v3638_v55 }
 0x356   :  { %2474 = vrsqrt.f32 %v1484_v39  ;;  %v1448_v21 = vmul.f32 0.083333336, %v1360_v9  ;;  %v1597_v34 = vmul.f32 %v3886_v61, %v1555_v30 }
 0x357   :  { %v2465_v33 = vpop.eup %2464  ;;  %v1487_v43 = vadd.f32 1e-05, %v1449_v25  ;;  %2315 = vmatprep.mubr.msk.f32.mxu1 %vm1091_vm3, %v1636_v49  ;;  %v1596_v29 = vmul.f32 %v3886_v61, %v1554_v60 }
 0x358   :  { %v2467_v45 = vpop.eup %2466  ;;  %v1486_v14 = vadd.f32 1e-05, %v1448_v21  ;;  %v1369_v16 = vpop.xlane.xlu1 %1368  ;;  %2316 = vmatmul.mubr.msk.f32.gmra.mrb[2].mxu1 %vm1091_vm3, %v1637_v44  ;;  %v1557_v63 = vmul.f32 %v2465_v33, %v3647_v5  ;;  %v1639_v17 = vadd.f32 %v3891_v51, %v1597_v34 }
 0x359   :  { %2476 = vrsqrt.f32 %v1487_v43  ;;  %v1451_v55 = vmul.f32 0.083333336, %v1369_v16  ;;  %v1366_v40 = vpop.xlane.xlu0 %1365  ;;  %v1638_v41 = vadd.f32 %v3891_v51, %v1596_v29  ;;  %v1556_v46 = vmul.f32 %v2467_v45, %v3652_v48 }
 0x35a   :  { %2478 = vrsqrt.f32 %v1486_v14  ;;  %v1450_v36 = vmul.f32 0.083333336, %v1366_v40  ;;  %v1599_v18 = vmul.f32 %v3886_v61, %v1557_v63 }
 0x35b   :  { %v2469_v47 = vpop.eup %2468  ;;  %v1489_v31 = vadd.f32 1e-05, %v1451_v55  ;;  %2318 = vmatprep.mubr.msk.f32.mxu1 %vm1091_vm3, %v1638_v41  ;;  %v1598_v4 = vmul.f32 %v3886_v61, %v1556_v46 }
 0x35c   :  { %v2471_v5 = vpop.eup %2470  ;;  %v1488_v10 = vadd.f32 1e-05, %v1450_v36  ;;  %v1375_v39 = vpop.xlane.xlu1 %1374  ;;  %2319 = vmatmul.mubr.msk.f32.gmra.mrb[4].mxu1 %vm1091_vm3, %v1639_v17  ;;  %v1559_v12 = vmul.f32 %v2469_v47, %v3661_v56  ;;  %v1641_v60 = vadd.f32 %v3891_v51, %v1599_v18 }
 0x35d   :  { %2480 = vrsqrt.f32 %v1489_v31  ;;  %v1453_v48 = vmul.f32 0.083333336, %v1375_v39  ;;  %v1372_v30 = vpop.xlane.xlu0 %1371  ;;  %v1640_v25 = vadd.f32 %v3891_v51, %v1598_v4  ;;  %v1558_v9 = vmul.f32 %v2471_v5, %v3666_v42 }
 0x35e   :  { %2482 = vrsqrt.f32 %v1488_v10  ;;  %v1452_v49 = vmul.f32 0.083333336, %v1372_v30  ;;  %v1601_v21 = vmul.f32 %v3886_v61, %v1559_v12 }
 0x35f   :  { %v2473_v44 = vpop.eup %2472  ;;  %v1491_v34 = vadd.f32 1e-05, %v1453_v48  ;;  %2321 = vmatprep.mubr.msk.f32.mxu1 %vm1091_vm3, %v1640_v25  ;;  %v1600_v33 = vmul.f32 %v3886_v61, %v1558_v9 }
 0x360   :  { %v2475_v56 = vpop.eup %2474  ;;  %v1490_v43 = vadd.f32 1e-05, %v1452_v49  ;;  %v1381_v29 = vpop.xlane.xlu1 %1380  ;;  %2322 = vmatmul.mubr.msk.f32.gmra.mrb[6].mxu1 %vm1091_vm3, %v1641_v60  ;;  %v1561_v45 = vmul.f32 %v2473_v44, %v3675_v54  ;;  %v1643_v40 = vadd.f32 %v3891_v51, %v1601_v21 }
 0x361   :  { %2484 = vrsqrt.f32 %v1491_v34  ;;  %v1455_v42 = vmul.f32 0.083333336, %v1381_v29  ;;  %v1378_v14 = vpop.xlane.xlu0 %1377  ;;  %v1642_v16 = vadd.f32 %v3891_v51, %v1600_v33  ;;  %v1560_v63 = vmul.f32 %v2475_v56, %v3680_v6 }
 0x362   :  { %2486 = vrsqrt.f32 %v1490_v43  ;;  %v1454_v55 = vmul.f32 0.083333336, %v1378_v14  ;;  %v1603_v41 = vmul.f32 %v3886_v61, %v1561_v45 }
 0x363   :  { %v2477_v46 = vpop.eup %2476  ;;  %v1493_v36 = vadd.f32 1e-05, %v1455_v42  ;;  %2324 = vmatprep.mubr.msk.f32.mxu1 %vm1091_vm3, %v1642_v16  ;;  %v1602_v17 = vmul.f32 %v3886_v61, %v1560_v63 }
 0x364   :  { %v2479_v54 = vpop.eup %2478  ;;  %v1492_v18 = vadd.f32 1e-05, %v1454_v55  ;;  %v1387_v47 = vpop.xlane.xlu1 %1386  ;;  %2325 = vmatmul.mubr.msk.f32.gmra.mrb[8].mxu1 %vm1091_vm3, %v1643_v40  ;;  %v1563_v31 = vmul.f32 %v2477_v46, %v3689_v8  ;;  %v1645_v12 = vadd.f32 %v3891_v51, %v1603_v41 }
 0x365   :  { %2488 = vrsqrt.f32 %v1493_v36  ;;  %v1457_v6 = vmul.f32 0.083333336, %v1387_v47  ;;  %v1384_v4 = vpop.xlane.xlu0 %1383  ;;  %v1644_v5 = vadd.f32 %v3891_v51, %v1602_v17  ;;  %v1562_v10 = vmul.f32 %v2479_v54, %v3694_v62 }
 0x366   :  { %2490 = vrsqrt.f32 %v1492_v18  ;;  %v1456_v39 = vmul.f32 0.083333336, %v1384_v4  ;;  %v1605_v48 = vmul.f32 %v3886_v61, %v1563_v31 }
 0x367   :  { %v2481_v30 = vpop.eup %2480  ;;  %v1495_v25 = vadd.f32 1e-05, %v1457_v6  ;;  %2327 = vmatprep.mubr.msk.f32.mxu1 %vm1091_vm3, %v1644_v5  ;;  %v1604_v9 = vmul.f32 %v3886_v61, %v1562_v10 }
 0x368   :  { %v2483_v8 = vpop.eup %2482  ;;  %v1494_v49 = vadd.f32 1e-05, %v1456_v39  ;;  %v1393_v60 = vpop.xlane.xlu1 %1392  ;;  %2328 = vmatmul.mubr.msk.f32.gmra.mrb[10].mxu1 %vm1091_vm3, %v1645_v12  ;;  %v1565_v21 = vmul.f32 %v2481_v30, %v3703_v59  ;;  %v1647_v43 = vadd.f32 %v3891_v51, %v1605_v48 }
 0x369   :  { %2492 = vrsqrt.f32 %v1495_v25  ;;  %v1459_v62 = vmul.f32 0.083333336, %v1393_v60  ;;  %v1390_v44 = vpop.xlane.xlu0 %1389  ;;  %v1646_v34 = vadd.f32 %v3891_v51, %v1604_v9  ;;  %v1564_v33 = vmul.f32 %v2483_v8, %v3708_v50 }
 0x36a   :  { %2494 = vrsqrt.f32 %v1494_v49  ;;  %v1458_v56 = vmul.f32 0.083333336, %v1390_v44  ;;  %v1607_v29 = vmul.f32 %v3886_v61, %v1565_v21 }
 0x36b   :  { %v2485_v45 = vpop.eup %2484  ;;  %v1497_v42 = vadd.f32 1e-05, %v1459_v62  ;;  %2330 = vmatprep.mubr.msk.f32.mxu1 %vm1091_vm3, %v1646_v34  ;;  %v1606_v14 = vmul.f32 %v3886_v61, %v1564_v33 }
 0x36c   :  { %v2487_v59 = vpop.eup %2486  ;;  %v1496_v16 = vadd.f32 1e-05, %v1458_v56  ;;  %v1399_v63 = vpop.xlane.xlu1 %1398  ;;  %2331 = vmatmul.mubr.msk.f32.gmra.mrb[12].mxu1 %vm1091_vm3, %v1647_v43  ;;  %v1567_v55 = vmul.f32 %v2485_v45, %v3717_v38  ;;  %v1649_v17 = vadd.f32 %v3891_v51, %v1607_v29 }
 0x36d   :  { %2496 = vrsqrt.f32 %v1497_v42  ;;  %v1461_v50 = vmul.f32 0.083333336, %v1399_v63  ;;  %v1396_v40 = vpop.xlane.xlu0 %1395  ;;  %v1648_v41 = vadd.f32 %v3891_v51, %v1606_v14  ;;  %v1566_v46 = vmul.f32 %v2487_v59, %v3722_v13 }
 0x36e   :  { %2498 = vrsqrt.f32 %v1496_v16  ;;  %v1460_v36 = vmul.f32 0.083333336, %v1396_v40  ;;  %v1609_v54 = vmul.f32 %v3886_v61, %v1567_v55 }
 0x36f   :  { %v2489_v18 = vpop.eup %2488  ;;  %v1499_v47 = vadd.f32 1e-05, %v1461_v50  ;;  %2333 = vmatprep.mubr.msk.f32.mxu1 %vm1091_vm3, %v1648_v41  ;;  %v1608_v31 = vmul.f32 %v3886_v61, %v1566_v46 }
 0x370   :  { %v2491_v38 = vpop.eup %2490  ;;  %v1498_v6 = vadd.f32 1e-05, %v1460_v36  ;;  %v1405_v4 = vpop.xlane.xlu1 %1404  ;;  %2334 = vmatmul.mubr.msk.f32.gmra.mrb[14].mxu1 %vm1091_vm3, %v1649_v17  ;;  %v1569_v5 = vmul.f32 %v2489_v18, %v3731_v20  ;;  %v1651_v30 = vadd.f32 %v3891_v51, %v1609_v54 }
 0x371   :  { %2500 = vrsqrt.f32 %v1499_v47  ;;  %v1463_v13 = vmul.f32 0.083333336, %v1405_v4  ;;  %v1402_v10 = vpop.xlane.xlu0 %1401  ;;  %v1650_v39 = vadd.f32 %v3891_v51, %v1608_v31  ;;  %v1568_v12 = vmul.f32 %v2491_v38, %v3736_v53 }
 0x372   :  { %2502 = vrsqrt.f32 %v1498_v6  ;;  %v1462_v48 = vmul.f32 0.083333336, %v1402_v10  ;;  %v1611_v25 = vmul.f32 %v3886_v61, %v1569_v5 }
 0x373   :  { %v2493_v9 = vpop.eup %2492  ;;  %v1501_v8 = vadd.f32 1e-05, %v1463_v13  ;;  %2336 = vmatprep.mubr.msk.f32.mxu1 %vm1091_vm3, %v1650_v39  ;;  %v1610_v49 = vmul.f32 %v3886_v61, %v1568_v12 }
 0x374   :  { %v2495_v20 = vpop.eup %2494  ;;  %v1500_v60 = vadd.f32 1e-05, %v1462_v48  ;;  %v1411_v21 = vpop.xlane.xlu1 %1410  ;;  %2337 = vmatmul.mubr.msk.f32.gmra.mrb[16].mxu1 %vm1091_vm3, %v1651_v30  ;;  %v1571_v62 = vmul.f32 %v2493_v9, %v3752_v3  ;;  %v1653_v43 = vadd.f32 %v3891_v51, %v1611_v25 }
 0x375   :  { %2504 = vrsqrt.f32 %v1501_v8  ;;  %v1465_v53 = vmul.f32 0.083333336, %v1411_v21  ;;  %v1408_v44 = vpop.xlane.xlu0 %1407  ;;  %v1652_v34 = vadd.f32 %v3891_v51, %v1610_v49  ;;  %v1570_v33 = vmul.f32 %v2495_v20, %v3757_v57 }
 0x376   :  { %2506 = vrsqrt.f32 %v1500_v60  ;;  %v1464_v56 = vmul.f32 0.083333336, %v1408_v44  ;;  %v1613_v29 = vmul.f32 %v3886_v61, %v1571_v62 }
 0x377   :  { %v2497_v45 = vpop.eup %2496  ;;  %v1503_v42 = vadd.f32 1e-05, %v1465_v53  ;;  %2339 = vmatprep.mubr.msk.f32.mxu1 %vm1091_vm3, %v1652_v34  ;;  %v1612_v14 = vmul.f32 %v3886_v61, %v1570_v33 }
 0x378   :  { %v2499_v3 = vpop.eup %2498  ;;  %v1502_v59 = vadd.f32 1e-05, %v1464_v56  ;;  %v1417_v16 = vpop.xlane.xlu1 %1416  ;;  %2340 = vmatmul.mubr.msk.f32.gmra.mrb[18].mxu1 %vm1091_vm3, %v1653_v43  ;;  %v1573_v63 = vmul.f32 %v2497_v45, %v3766_v11  ;;  %v1655_v46 = vadd.f32 %v3891_v51, %v1613_v29 }
 0x379   :  { %2508 = vrsqrt.f32 %v1503_v42  ;;  %v1467_v57 = vmul.f32 0.083333336, %v1417_v16  ;;  %v1414_v55 = vpop.xlane.xlu0 %1413  ;;  %v1654_v50 = vadd.f32 %v3891_v51, %v1612_v14  ;;  %v1572_v40 = vmul.f32 %v2499_v3, %v3771_v52 }
 0x37a   :  { %2510 = vrsqrt.f32 %v1502_v59  ;;  %v1466_v41 = vmul.f32 0.083333336, %v1414_v55  ;;  %v1615_v36 = vmul.f32 %v3886_v61, %v1573_v63 }
 0x37b   :  { %v2501_v17 = vpop.eup %2500  ;;  %v1505_v54 = vadd.f32 1e-05, %v1467_v57  ;;  %2342 = vmatprep.mubr.msk.f32.mxu1 %vm1091_vm3, %v1654_v50  ;;  %v1614_v18 = vmul.f32 %v3886_v61, %v1572_v40 }
 0x37c   :  { %v2503_v11 = vpop.eup %2502  ;;  %v1504_v47 = vadd.f32 1e-05, %v1466_v41  ;;  %v1423_v31 = vpop.xlane.xlu1 %1422  ;;  %2343 = vmatmul.mubr.msk.f32.gmra.mrb[20].mxu1 %vm1091_vm3, %v1655_v46  ;;  %v1575_v38 = vmul.f32 %v2501_v17, %v3780_v1  ;;  %v1657_v10 = vadd.f32 %v3891_v51, %v1615_v36 }
 0x37d   :  { %2512 = vrsqrt.f32 %v1505_v54  ;;  %v1469_v52 = vmul.f32 0.083333336, %v1423_v31  ;;  %v1420_v6 = vpop.xlane.xlu0 %1419  ;;  %v1656_v4 = vadd.f32 %v3891_v51, %v1614_v18  ;;  %v1574_v5 = vmul.f32 %v2503_v11, %v3785_v24 }
 0x37e   :  { %2514 = vrsqrt.f32 %v1504_v47  ;;  %v1468_v13 = vmul.f32 0.083333336, %v1420_v6  ;;  %v1617_v39 = vmul.f32 %v3886_v61, %v1575_v38 }
 0x37f   :  { %v2505_v12 = vpop.eup %2504  ;;  %v1507_v48 = vadd.f32 1e-05, %v1469_v52  ;;  %2345 = vmatprep.mubr.msk.f32.mxu1 %vm1091_vm3, %v1656_v4  ;;  %v1616_v30 = vmul.f32 %v3886_v61, %v1574_v5 }
 0x380   :  { %v2507_v1 = vpop.eup %2506  ;;  %v1506_v25 = vadd.f32 1e-05, %v1468_v13  ;;  %v1429_v9 = vpop.xlane.xlu1 %1428  ;;  %2346 = vmatmul.mubr.msk.f32.gmra.mrb[22].mxu1 %vm1091_vm3, %v1657_v10  ;;  %v1577_v8 = vmul.f32 %v2505_v12, %v3794_v15  ;;  %v1659_v62 = vadd.f32 %v3891_v51, %v1617_v39 }
 0x381   :  { %2516 = vrsqrt.f32 %v1507_v48  ;;  %v1471_v24 = vmul.f32 0.083333336, %v1429_v9  ;;  %v1426_v49 = vpop.xlane.xlu0 %1425  ;;  %v1658_v20 = vadd.f32 %v3891_v51, %v1616_v30  ;;  %v1576_v60 = vmul.f32 %v2507_v1, %v3799_v23 }
 0x382   :  { %2518 = vrsqrt.f32 %v1506_v25  ;;  %v1470_v21 = vmul.f32 0.083333336, %v1426_v49  ;;  %v1619_v53 = vmul.f32 %v3886_v61, %v1577_v8 }
 0x383   :  { %v2509_v44 = vpop.eup %2508  ;;  %v1509_v34 = vadd.f32 1e-05, %v1471_v24  ;;  %2348 = vmatprep.mubr.msk.f32.mxu1 %vm1091_vm3, %v1658_v20  ;;  %v1618_v33 = vmul.f32 %v3886_v61, %v1576_v60 }
 0x384   :  { %v2511_v15 = vpop.eup %2510  ;;  %v1508_v56 = vadd.f32 1e-05, %v1470_v21  ;;  %v1435_v43 = vpop.xlane.xlu1 %1434  ;;  %2349 = vmatmul.mubr.msk.f32.gmra.mrb[24].mxu1 %vm1091_vm3, %v1659_v62  ;;  %v1579_v29 = vmul.f32 %v2509_v44, %v3808_v58  ;;  %v1661_v59 = vadd.f32 %v3891_v51, %v1619_v53 }
 0x385   :  { %2520 = vrsqrt.f32 %v1509_v34  ;;  %v1473_v23 = vmul.f32 0.083333336, %v1435_v43  ;;  %v1432_v45 = vpop.xlane.xlu0 %1431  ;;  %v1660_v42 = vadd.f32 %v3891_v51, %v1618_v33  ;;  %v1578_v14 = vmul.f32 %v2511_v15, %v3813_v35 }
 0x386   :  { %2522 = vrsqrt.f32 %v1508_v56  ;;  %v1472_v3 = vmul.f32 0.083333336, %v1432_v45  ;;  %v1621_v16 = vmul.f32 %v3886_v61, %v1579_v29 }
 0x387   :  { %v2513_v63 = vpop.eup %2512  ;;  %v1511_v57 = vadd.f32 1e-05, %v1473_v23  ;;  %2351 = vmatprep.mubr.msk.f32.mxu1 %vm1091_vm3, %v1660_v42  ;;  %v1620_v55 = vmul.f32 %v3886_v61, %v1578_v14 }
 0x388   :  { %v2515_v58 = vpop.eup %2514  ;;  %v1510_v50 = vadd.f32 1e-05, %v1472_v3  ;;  %2352 = vmatmul.mubr.msk.f32.gmra.mrb[26].mxu1 %vm1091_vm3, %v1661_v59  ;;  %v1581_v40 = vmul.f32 %v2513_v63, %v3822_v22  ;;  %v1663_v46 = vadd.f32 %v3891_v51, %v1621_v16 }
 0x389   :  { %2524 = vrsqrt.f32 %v1511_v57  ;;  %v1662_v35 = vadd.f32 %v3891_v51, %v1620_v55  ;;  %v1580_v41 = vmul.f32 %v2515_v58, %v3827_v32 }
 0x38a   :  { %2526 = vrsqrt.f32 %v1510_v50  ;;  %v1623_v36 = vmul.f32 %v3886_v61, %v1581_v40 }
 0x38b   :  { %v2517_v17 = vpop.eup %2516  ;;  %2354 = vmatprep.mubr.msk.f32.mxu1 %vm1091_vm3, %v1662_v35  ;;  %v1622_v54 = vmul.f32 %v3886_v61, %v1580_v41 }
 0x38c   :  { %v2519_v18 = vpop.eup %2518  ;;  %2355 = vmatmul.mubr.msk.f32.gmra.mrb[28].mxu1 %vm1091_vm3, %v1663_v46  ;;  %v1583_v22 = vmul.f32 %v2517_v17, %v3836_v26  ;;  %v1665_v32 = vadd.f32 %v3891_v51, %v1623_v36 }
 0x38d   :  { %v1664_v11 = vadd.f32 %v3891_v51, %v1622_v54  ;;  %v1582_v47 = vmul.f32 %v2519_v18, %v3841_v28 }
 0x38e   :  { %v1625_v31 = vmul.f32 %v3886_v61, %v1583_v22 }
 0x38f   :  { %v2521_v38 = vpop.eup %2520  ;;  %2357 = vmatprep.mubr.msk.f32.mxu1 %vm1091_vm3, %v1664_v11  ;;  %v1624_v52 = vmul.f32 %v3886_v61, %v1582_v47 }
 0x390   :  { %v2523_v6 = vpop.eup %2522  ;;  %2358 = vmatmul.mubr.msk.f32.gmra.mrb[30].mxu1 %vm1091_vm3, %v1665_v32  ;;  %v1585_v4 = vmul.f32 %v2521_v38, %v3850_v2  ;;  %v1667_v28 = vadd.f32 %v3891_v51, %v1625_v31 }
 0x391   :  { %v1666_v26 = vadd.f32 %v3891_v51, %v1624_v52  ;;  %v1584_v5 = vmul.f32 %v2523_v6, %v3855_v7 }
 0x392   :  { %v1627_v13 = vmul.f32 %v3886_v61, %v1585_v4 }
 0x393   :  { %v2525_v10 = vpop.eup %2524  ;;  %2360 = vmatprep.mubr.msk.f32.mxu1 %vm1091_vm3, %v1666_v26  ;;  %v1626_v39 = vmul.f32 %v3886_v61, %v1584_v5 }
 0x394   :  { %v2527_v12 = vpop.eup %2526  ;;  %2361 = vmatmul.mubr.msk.f32.gmra.mrb[32].mxu1 %vm1091_vm3, %v1667_v28  ;;  %v1587_v48 = vmul.f32 %v2525_v10, %v3864_v27  ;;  %v1669_v7 = vadd.f32 %v3891_v51, %v1627_v13  ;;  %v1676_v27 = vsub.s32 5, %v3168_v19 }
 0x395   :  { %v1668_v2 = vadd.f32 %v3891_v51, %v1626_v39  ;;  %v1586_v30 = vmul.f32 %v2527_v12, %v3869_v0 }
 0x396   :  { %v1629_v1 = vmul.f32 %v3886_v61, %v1587_v48  ;;  %v4045_v0 = vrot.slane %v3883_v37, %v1676_v27 }
 0x397   :  { %2363 = vmatprep.mubr.msk.f32.mxu1 %vm1091_vm3, %v1668_v2  ;;  %v1628_v25 = vmul.f32 %v3886_v61, %v1586_v30 }
 0x398   :  { %2364 = vmatmul.mubr.msk.f32.gmra.mrb[34].mxu1 %vm1091_vm3, %v1669_v7  ;;  %v1671_v8 = vadd.f32 %v3891_v51, %v1629_v1 }
 0x399   :  { %v1670_v9 = vadd.f32 %v3891_v51, %v1628_v25 }
 0x39b   :  { %2366 = vmatprep.mubr.msk.f32.mxu1 %vm1091_vm3, %v1670_v9 }
 0x39c   :  { %2367 = vmatmul.mubr.msk.f32.gmra.mrb[36].mxu1 %vm1091_vm3, %v1671_v8 }
 0x427   :  { %v2314_v24 = vpop.f32.mrb[0].mxu1 }
 0x428   :  { %v1867_v49 = vadd.f32 %v2314_v24, %v4045_v0  ;;  %v1861_v20 = vpop.f32.mrb[1].mxu1 }
 0x429   :  { %v1862_v61 = vadd.f32 %v1861_v20, %v4045_v0 }
 0x42a   :  { %2051 = vst.msk [vmem:[%s4241_s4 + $0x8] sm:$0xff] %vm94_vm0, %v1867_v49 }
 0x42b   :  { %2050 = vst.msk [vmem:[%s4241_s4] sm:$0xff] %vm94_vm0, %v1862_v61  ;;  %v2317_v19 = vpop.f32.mrb[2].mxu1 }
 0x42c   :  { %v1877_v37 = vadd.f32 %v2317_v19, %v4045_v0  ;;  %v1871_v51 = vpop.f32.mrb[3].mxu1 }
 0x42d   :  { %v1872_v60 = vadd.f32 %v1871_v51, %v4045_v0 }
 0x42e   :  { %2053 = vst.msk [vmem:[%s4241_s4 + $0x18] sm:$0xff] %vm94_vm0, %v1877_v37 }
 0x42f   :  { %2052 = vst.msk [vmem:[%s4241_s4 + $0x10] sm:$0xff] %vm94_vm0, %v1872_v60  ;;  %v2320_v21 = vpop.f32.mrb[4].mxu1 }
 0x430   :  { %v1887_v62 = vadd.f32 %v2320_v21, %v4045_v0  ;;  %v1881_v53 = vpop.f32.mrb[5].mxu1 }
 0x431   :  { %v1882_v44 = vadd.f32 %v1881_v53, %v4045_v0 }
 0x432   :  { %2055 = vst.msk [vmem:[%s4241_s4 + $0x28] sm:$0xff] %vm94_vm0, %v1887_v62 }
 0x433   :  { %2054 = vst.msk [vmem:[%s4241_s4 + $0x20] sm:$0xff] %vm94_vm0, %v1882_v44  ;;  %v2323_v34 = vpop.f32.mrb[6].mxu1 }
 0x434   :  { %v1897_v33 = vadd.f32 %v2323_v34, %v4045_v0  ;;  %v1891_v15 = vpop.f32.mrb[7].mxu1 }
 0x435   :  { %v1892_v56 = vadd.f32 %v1891_v15, %v4045_v0 }
 0x436   :  { %2057 = vst.msk [vmem:[%s4241_s4 + $0x38] sm:$0xff] %vm94_vm0, %v1897_v33 }
 0x437   :  { %2056 = vst.msk [vmem:[%s4241_s4 + $0x30] sm:$0xff] %vm94_vm0, %v1892_v56  ;;  %v2326_v43 = vpop.f32.mrb[8].mxu1 }
 0x438   :  { %v1907_v29 = vadd.f32 %v2326_v43, %v4045_v0  ;;  %v1901_v23 = vpop.f32.mrb[9].mxu1 }
 0x439   :  { %v1902_v45 = vadd.f32 %v1901_v23, %v4045_v0 }
 0x43a   :  { %2059 = vst.msk [vmem:[%s4241_s4 + $0x48] sm:$0xff] %vm94_vm0, %v1907_v29 }
 0x43b   :  { %2058 = vst.msk [vmem:[%s4241_s4 + $0x40] sm:$0xff] %vm94_vm0, %v1902_v45  ;;  %v2329_v42 = vpop.f32.mrb[10].mxu1 }
 0x43c   :  { %v1917_v14 = vadd.f32 %v2329_v42, %v4045_v0  ;;  %v1911_v3 = vpop.f32.mrb[11].mxu1 }
 0x43d   :  { %v1912_v59 = vadd.f32 %v1911_v3, %v4045_v0 }
 0x43e   :  { %2061 = vst.msk [vmem:[%s4241_s4 + $0x58] sm:$0xff] %vm94_vm0, %v1917_v14 }
 0x43f   :  { %2060 = vst.msk [vmem:[%s4241_s4 + $0x50] sm:$0xff] %vm94_vm0, %v1912_v59  ;;  %v2332_v16 = vpop.f32.mrb[12].mxu1 }
 0x440   :  { %v1927_v63 = vadd.f32 %v2332_v16, %v4045_v0  ;;  %v1921_v57 = vpop.f32.mrb[13].mxu1 }
 0x441   :  { %v1922_v55 = vadd.f32 %v1921_v57, %v4045_v0 }
 0x442   :  { %2063 = vst.msk [vmem:[%s4241_s4 + $0x68] sm:$0xff] %vm94_vm0, %v1927_v63 }
 0x443   :  { %2062 = vst.msk [vmem:[%s4241_s4 + $0x60] sm:$0xff] %vm94_vm0, %v1922_v55  ;;  %v2335_v58 = vpop.f32.mrb[14].mxu1 }
 0x444   :  { %v1937_v50 = vadd.f32 %v2335_v58, %v4045_v0  ;;  %v1931_v40 = vpop.f32.mrb[15].mxu1 }
 0x445   :  { %v1932_v35 = vadd.f32 %v1931_v40, %v4045_v0 }
 0x446   :  { %2065 = vst.msk [vmem:[%s4241_s4 + $0x78] sm:$0xff] %vm94_vm0, %v1937_v50 }
 0x447   :  { %2064 = vst.msk [vmem:[%s4241_s4 + $0x70] sm:$0xff] %vm94_vm0, %v1932_v35  ;;  %v2338_v41 = vpop.f32.mrb[16].mxu1 }
 0x448   :  { %v1947_v46 = vadd.f32 %v2338_v41, %v4045_v0  ;;  %v1941_v36 = vpop.f32.mrb[17].mxu1 }
 0x449   :  { %v1942_v17 = vadd.f32 %v1941_v36, %v4045_v0 }
 0x44a   :  { %2067 = vst.msk [vmem:[%s4241_s4 + $0x88] sm:$0xff] %vm94_vm0, %v1947_v46 }
 0x44b   :  { %2066 = vst.msk [vmem:[%s4241_s4 + $0x80] sm:$0xff] %vm94_vm0, %v1942_v17  ;;  %v2341_v54 = vpop.f32.mrb[18].mxu1 }
 0x44c   :  { %v1957_v18 = vadd.f32 %v2341_v54, %v4045_v0  ;;  %v1951_v22 = vpop.f32.mrb[19].mxu1 }
 0x44d   :  { %v1952_v11 = vadd.f32 %v1951_v22, %v4045_v0 }
 0x44e   :  { %2069 = vst.msk [vmem:[%s4241_s4 + $0x98] sm:$0xff] %vm94_vm0, %v1957_v18 }
 0x44f   :  { %2068 = vst.msk [vmem:[%s4241_s4 + $0x90] sm:$0xff] %vm94_vm0, %v1952_v11  ;;  %v2344_v47 = vpop.f32.mrb[20].mxu1 }
 0x450   :  { %v1967_v32 = vadd.f32 %v2344_v47, %v4045_v0  ;;  %v1961_v31 = vpop.f32.mrb[21].mxu1 }
 0x451   :  { %v1962_v38 = vadd.f32 %v1961_v31, %v4045_v0 }
 0x452   :  { %2071 = vst.msk [vmem:[%s4241_s4 + $0xa8] sm:$0xff] %vm94_vm0, %v1967_v32 }
 0x453   :  { %2070 = vst.msk [vmem:[%s4241_s4 + $0xa0] sm:$0xff] %vm94_vm0, %v1962_v38  ;;  %v2347_v52 = vpop.f32.mrb[22].mxu1 }
 0x454   :  { %v1977_v6 = vadd.f32 %v2347_v52, %v4045_v0  ;;  %v1971_v4 = vpop.f32.mrb[23].mxu1 }
 0x455   :  { %v1972_v26 = vadd.f32 %v1971_v4, %v4045_v0 }
 0x456   :  { %2073 = vst.msk [vmem:[%s4241_s4 + $0xb8] sm:$0xff] %vm94_vm0, %v1977_v6 }
 0x457   :  { %2072 = vst.msk [vmem:[%s4241_s4 + $0xb0] sm:$0xff] %vm94_vm0, %v1972_v26  ;;  %v2350_v5 = vpop.f32.mrb[24].mxu1 }
 0x458   :  { %v1987_v28 = vadd.f32 %v2350_v5, %v4045_v0  ;;  %v1981_v13 = vpop.f32.mrb[25].mxu1 }
 0x459   :  { %v1982_v10 = vadd.f32 %v1981_v13, %v4045_v0 }
 0x45a   :  { %2075 = vst.msk [vmem:[%s4241_s4 + $0xc8] sm:$0xff] %vm94_vm0, %v1987_v28 }
 0x45b   :  { %2074 = vst.msk [vmem:[%s4241_s4 + $0xc0] sm:$0xff] %vm94_vm0, %v1982_v10  ;;  %v2353_v39 = vpop.f32.mrb[26].mxu1 }
 0x45c   :  { %v1997_v12 = vadd.f32 %v2353_v39, %v4045_v0  ;;  %v1991_v48 = vpop.f32.mrb[27].mxu1 }
 0x45d   :  { %v1992_v2 = vadd.f32 %v1991_v48, %v4045_v0 }
 0x45e   :  { %2077 = vst.msk [vmem:[%s4241_s4 + $0xd8] sm:$0xff] %vm94_vm0, %v1997_v12 }
 0x45f   :  { %2076 = vst.msk [vmem:[%s4241_s4 + $0xd0] sm:$0xff] %vm94_vm0, %v1992_v2  ;;  %v2356_v30 = vpop.f32.mrb[28].mxu1 }
 0x460   :  { %v2007_v7 = vadd.f32 %v2356_v30, %v4045_v0  ;;  %v2001_v1 = vpop.f32.mrb[29].mxu1 }
 0x461   :  { %v2002_v25 = vadd.f32 %v2001_v1, %v4045_v0 }
 0x462   :  { %2079 = vst.msk [vmem:[%s4241_s4 + $0xe8] sm:$0xff] %vm94_vm0, %v2007_v7 }
 0x463   :  { %2078 = vst.msk [vmem:[%s4241_s4 + $0xe0] sm:$0xff] %vm94_vm0, %v2002_v25  ;;  %v2359_v9 = vpop.f32.mrb[30].mxu1 }
 0x464   :  { %v2017_v8 = vadd.f32 %v2359_v9, %v4045_v0  ;;  %v2011_v27 = vpop.f32.mrb[31].mxu1 }
 0x465   :  { %v2012_v24 = vadd.f32 %v2011_v27, %v4045_v0 }
 0x466   :  { %2081 = vst.msk [vmem:[%s4241_s4 + $0xf8] sm:$0xff] %vm94_vm0, %v2017_v8 }
 0x467   :  { %2080 = vst.msk [vmem:[%s4241_s4 + $0xf0] sm:$0xff] %vm94_vm0, %v2012_v24  ;;  %v2362_v49 = vpop.f32.mrb[32].mxu1 }
 0x468   :  { %v2027_v20 = vadd.f32 %v2362_v49, %v4045_v0  ;;  %v2021_v61 = vpop.f32.mrb[33].mxu1 }
 0x469   :  { %v2022_v19 = vadd.f32 %v2021_v61, %v4045_v0 }
 0x46a   :  { %2083 = vst.msk [vmem:[%s4241_s4 + $0x108] sm:$0xff] %vm94_vm0, %v2027_v20 }
 0x46b   :  { %2082 = vst.msk [vmem:[%s4241_s4 + $0x100] sm:$0xff] %vm94_vm0, %v2022_v19  ;;  %v2365_v37 = vpop.f32.mrb[34].mxu1 }
 0x46c   :  { %v2037_v51 = vadd.f32 %v2365_v37, %v4045_v0  ;;  %v2031_v60 = vpop.f32.mrb[35].mxu1 }
 0x46d   :  { %v2032_v21 = vadd.f32 %v2031_v60, %v4045_v0 }
 0x46e   :  { %2085 = vst.msk [vmem:[%s4241_s4 + $0x118] sm:$0xff] %vm94_vm0, %v2037_v51 }
 0x46f   :  { %2084 = vst.msk [vmem:[%s4241_s4 + $0x110] sm:$0xff] %vm94_vm0, %v2032_v21  ;;  %v2368_v62 = vpop.f32.mrb[36].mxu1 }
 0x470   :  { %v2047_v53 = vadd.f32 %v2368_v62, %v4045_v0  ;;  %v2041_v44 = vpop.f32.mrb[37].mxu1 }
 0x471   :  { %v2042_v34 = vadd.f32 %v2041_v44, %v4045_v0 }
 0x472   :  { %2087 = vst.msk [vmem:[%s4241_s4 + $0x128] sm:$0xf] %vm206_vm1, %v2047_v53 }
 0x473   :  { %2086 = vst.msk [vmem:[%s4241_s4 + $0x120] sm:$0xff] %vm94_vm0, %v2042_v34 }

</bundles_post_ra>
